<compile_context>
chip_gen: v5e
topology: v5e:2x2
jax: 0.10.0
libtpu: 0.0.40
codegen_flags: <defaults>
</compile_context>

<pallas_src>
import numpy as np

import jax
import jax.numpy as jnp
from jax import lax
from jax.experimental import pallas as pl
from jax.experimental.pallas import tpu as pltpu


_TAPS = [(kh, kw) for kh in range(3) for kw in range(3)]   # im2col row order


# ---------------------------------------------------------------------------
# Host-side helpers (constants built once, passed as kernel operands)
# ---------------------------------------------------------------------------
def _num_tensorcores():
    """2 for chips with two TensorCores per device (v7x, v4, v5p), else 1."""
    try:
        kind = jax.devices()[0].device_kind.lower().replace(" ", "")
    except Exception:
        return 1
    if any(t in kind for t in ("v7", "7x", "v4", "v5p")):
        return 2
    return 1


def _border_masks_np(H, W, n_img):
    """(9, n_img*H*W) 0/1 validity mask per 3x3 tap ('same' padding)."""
    hh, ww = np.meshgrid(np.arange(H), np.arange(W), indexing="ij")
    hh, ww = hh.reshape(-1), ww.reshape(-1)
    m = np.zeros((9, n_img * H * W), np.float32)
    for t, (kh, kw) in enumerate(_TAPS):
        dh, dw = kh - 1, kw - 1
        valid = ((hh + dh >= 0) & (hh + dh < H) &
                 (ww + dw >= 0) & (ww + dw < W)).astype(np.float32)
        m[t] = np.tile(valid, n_img)
    return m


def _stride2_sel_np(H, W, n_img):
    """(n_img*H*W, n_img*Ho*Wo) block-diagonal 0/1 column-selection matrix."""
    Ho, Wo = (H - 1) // 2 + 1, (W - 1) // 2 + 1
    hw, hwo = H * W, Ho * Wo
    s = np.zeros((hw, hwo), np.float32)
    for oh in range(Ho):
        for ow in range(Wo):
            s[2 * oh * W + 2 * ow, oh * Wo + ow] = 1.0
    sel = np.zeros((n_img * hw, n_img * hwo), np.float32)
    for b in range(n_img):
        sel[b * hw:(b + 1) * hw, b * hwo:(b + 1) * hwo] = s
    return sel


def _pack_w_taps(w_oihw, cin_pad):
    """(O, I, 3, 3) -> (O, 9*cin_pad), columns ordered (kh, kw, ci) with the
    real input channels in the first I positions of each tap (rest zero)."""
    O, I, KH, KW = w_oihw.shape
    w = jnp.asarray(w_oihw, jnp.float32)
    if cin_pad > I:
        w = jnp.concatenate(
            [w, jnp.zeros((O, cin_pad - I, KH, KW), jnp.float32)], axis=1)
    return jnp.transpose(w, (0, 2, 3, 1)).reshape(O, KH * KW * cin_pad)


# ---------------------------------------------------------------------------
# In-kernel helper
# ---------------------------------------------------------------------------
def _im2col_taps(act, width, mask):
    """act (Cin, HW) f32, mask (9, HW) f32 0/1 -> (9*Cin, HW) bf16 patches.

    Built in registers: 9 lane rolls (XLU) + mask multiplies + one sublane
    concatenate.  Row-wrap / image-wrap positions of the circular roll are
    exactly the positions the masks zero.
    """
    cin, hw = act.shape
    taps = []
    for t, (kh, kw) in enumerate(_TAPS):
        off = (kh - 1) * width + (kw - 1)
        if off == 0:
            taps.append(act)
        else:
            rolled = pltpu.roll(act, shift=(-off) % hw, axis=1)
            taps.append(rolled * mask[t:t + 1, :])
    return jnp.concatenate(taps, axis=0).astype(jnp.bfloat16)


# ---------------------------------------------------------------------------
# Fused ResNetLayer forward (single pallas_call)
# ---------------------------------------------------------------------------
def resnet_layer_forward(x_nchw, params, eps=1e-5):
    """x_nchw: (N, C, H, W) float32 (PyTorch layout). Returns (N, C', H', W')."""
    N, C0, H0, W0 = x_nchw.shape
    HW0 = H0 * W0

    G = _num_tensorcores()
    if N % G != 0:
        G = 1
    n_img = N // G                      # images lane-stacked per grid block
    C0p = ((C0 + 7) // 8) * 8           # pad input channels to a sublane tile

    # (N,C,H,W) -> (G, C0p, n_img*H*W): n_img images stacked along lanes.
    x_flat = (x_nchw.astype(jnp.float32)
              .reshape(G, n_img, C0, HW0)
              .transpose(0, 2, 1, 3)
              .reshape(G, C0, n_img * HW0))
    if C0p > C0:
        x_flat = jnp.concatenate(
            [x_flat, jnp.zeros((G, C0p - C0, n_img * HW0), jnp.float32)],
            axis=1)

    args = [x_flat]
    in_specs = [pl.BlockSpec((1, C0p, n_img * HW0), lambda g: (g, 0, 0))]

    def _add_const(a):
        i = len(args)
        args.append(a)
        in_specs.append(pl.BlockSpec(a.shape, lambda g, _r=a.ndim: (0,) * _r))
        return i

    def _fold_bn(bn, cout):
        gamma, beta, mean, var = [jnp.asarray(v, jnp.float32) for v in bn]
        inv_std = 1.0 / jnp.sqrt(var + eps)
        scale = (gamma * inv_std).reshape(cout, 1)
        shift = (beta - mean * gamma * inv_std).reshape(cout, 1)
        return scale, shift

    # ---- static plan + flat argument list ----------------------------------
    plan = []
    mask_cache, sel_cache = {}, {}

    def _mask_idx(h, w):
        if (h, w) not in mask_cache:
            mask_cache[(h, w)] = _add_const(
                jnp.asarray(_border_masks_np(h, w, n_img), jnp.float32))
        return mask_cache[(h, w)]

    C, H, W = C0, H0, W0          # logical channel / spatial tracking
    Crow = C0p                    # rows of the activation actually laid out

    for p in params:
        cout, cin = p["w1"].shape[0], p["w1"].shape[1]
        assert cin == C
        ds = p["downsampling"]
        if ds == 2:
            Ho, Wo = (H - 1) // 2 + 1, (W - 1) // 2 + 1
            if (H, W) not in sel_cache:
                sel_cache[(H, W)] = _add_const(
                    jnp.asarray(_stride2_sel_np(H, W, n_img), jnp.bfloat16))
            sel_idx = sel_cache[(H, W)]
        else:
            assert ds == 1
            Ho, Wo, sel_idx = H, W, None

        s1, b1 = _fold_bn(p["bn1"], cout)
        s2, b2 = _fold_bn(p["bn2"], cout)

        cin_pad = Crow
        w1_full = _pack_w_taps(p["w1"], cin_pad)          # (Cout, 9*cin_pad)

        entry = {
            "cout": cout, "W_in": W, "W_out": Wo,
            "mask_in": _mask_idx(H, W), "mask_out": _mask_idx(Ho, Wo),
            "sel": sel_idx,
            "s1": _add_const(s1), "b1": _add_const(b1),
            "s2": _add_const(s2), "b2": _add_const(b2),
            "w2": _add_const(
                _pack_w_taps(p["w2"], cout).astype(jnp.bfloat16)),
        }

        if p["shortcut"] is not None:
            # Fuse the 1x1 shortcut conv into conv1: extra output rows of w1,
            # non-zero only at the centre-tap (t == 4) columns.
            w_sc, bn_sc = p["shortcut"]
            w_sc = jnp.asarray(w_sc, jnp.float32).reshape(cout, cin)
            sc_rows = jnp.zeros((cout, 9 * cin_pad), jnp.float32)
            sc_rows = sc_rows.at[:, 4 * cin_pad:4 * cin_pad + cin].set(w_sc)
            w1_full = jnp.concatenate([w1_full, sc_rows], axis=0)
            s_sc, b_sc = _fold_bn(bn_sc, cout)
            entry["has_shortcut"] = True
            entry["s_sc"] = _add_const(s_sc)
            entry["b_sc"] = _add_const(b_sc)
        else:
            entry["has_shortcut"] = False

        entry["w1"] = _add_const(w1_full.astype(jnp.bfloat16))
        plan.append(entry)
        C, H, W = cout, Ho, Wo
        Crow = cout

    n_in = len(args)
    Cf, Hf, Wf = C, H, W
    HWf = Hf * Wf

    # ---- the fused kernel ----------------------------------------------------
    def kernel(*refs):
        o_ref = refs[n_in]
        act = refs[0][0]                                  # (C0p, n_img*HW0) f32
        for bp in plan:
            cout = bp["cout"]

            # conv1 (+ fused 1x1 shortcut rows): one MXU contraction.
            patches = _im2col_taps(act, bp["W_in"], refs[bp["mask_in"]][...])
            y = jnp.dot(refs[bp["w1"]][...], patches,
                        preferred_element_type=jnp.float32)
            if bp["sel"] is not None:
                # Single stride-2 selection matmul for main ++ shortcut rows.
                y = jnp.dot(y.astype(jnp.bfloat16), refs[bp["sel"]][...],
                            preferred_element_type=jnp.float32)

            if bp["has_shortcut"]:
                res = (y[cout:2 * cout] * refs[bp["s_sc"]][...]
                       + refs[bp["b_sc"]][...])
                y = y[0:cout]
            else:
                res = act

            # BN1 + ReLU (f32).
            y = jnp.maximum(y * refs[bp["s1"]][...] + refs[bp["b1"]][...], 0.0)

            # conv2 (stride 1) + BN2.
            patches = _im2col_taps(y, bp["W_out"], refs[bp["mask_out"]][...])
            y = jnp.dot(refs[bp["w2"]][...], patches,
                        preferred_element_type=jnp.float32)
            y = y * refs[bp["s2"]][...] + refs[bp["b2"]][...]

            act = y + res                                  # residual add (f32)

        o_ref[0] = act.astype(o_ref.dtype)

    out = pl.pallas_call(
        kernel,
        out_shape=jax.ShapeDtypeStruct((G, Cf, n_img * HWf), jnp.float32),
        grid=(G,),
        in_specs=in_specs,
        out_specs=pl.BlockSpec((1, Cf, n_img * HWf), lambda g: (g, 0, 0)),
        compiler_params=pltpu.CompilerParams(
            dimension_semantics=("parallel",)),
    )(*args)

    # (G, Cf, n_img*HWf) -> (N, Cf, Hf, Wf)
    return (out.reshape(G, Cf, n_img, HWf)
            .transpose(0, 2, 1, 3)
            .reshape(N, Cf, Hf, Wf))


# ---------------------------------------------------------------------------
# Deterministic parameter init (shapes follow the PyTorch module)
# ---------------------------------------------------------------------------
def _init_bn(key, c):
    k1, k2, k3, k4 = jax.random.split(key, 4)
    gamma = 1.0 + 0.1 * jax.random.normal(k1, (c,), jnp.float32)
    beta = 0.1 * jax.random.normal(k2, (c,), jnp.float32)
    mean = 0.1 * jax.random.normal(k3, (c,), jnp.float32)
    var = 0.5 + jax.random.uniform(k4, (c,), jnp.float32)
    return gamma, beta, mean, var


def init_params(key, in_channels, out_channels, n):
    params = []
    cin = in_channels
    for _ in range(n):
        ds = 2 if cin != out_channels else 1
        key, k1, k2, k3, k4, k5, k6 = jax.random.split(key, 7)
        blk = {
            "downsampling": ds,
            "w1": 0.1 * jax.random.normal(k1, (out_channels, cin, 3, 3), jnp.float32),
            "bn1": _init_bn(k2, out_channels),
            "w2": 0.1 * jax.random.normal(k3, (out_channels, out_channels, 3, 3),
                                          jnp.float32),
            "bn2": _init_bn(k4, out_channels),
            "shortcut": None,
        }
        if cin != out_channels:  # expansion == 1 -> 1x1 conv + BN shortcut
            blk["shortcut"] = (
                0.1 * jax.random.normal(k5, (out_channels, cin, 1, 1), jnp.float32),
                _init_bn(k6, out_channels),
            )
        params.append(blk)
        cin = out_channels
    return params


# ---------------------------------------------------------------------------
# Pure-JAX reference (correctness check only)
# ---------------------------------------------------------------------------
def _ref_conv_bn(x, w, bn, stride, relu, eps=1e-5):
    gamma, beta, mean, var = bn
    p = w.shape[2] // 2
    y = lax.conv_general_dilated(
        x, w, window_strides=(stride, stride), padding=[(p, p), (p, p)],
        dimension_numbers=("NCHW", "OIHW", "NCHW"),
        precision=lax.Precision.HIGHEST)
    inv_std = 1.0 / jnp.sqrt(var + eps)
    y = y * (gamma * inv_std).reshape(1, -1, 1, 1) \
        + (beta - mean * gamma * inv_std).reshape(1, -1, 1, 1)
    if relu:
        y = jnp.maximum(y, 0.0)
    return y


def _ref_layer(x, params):
    for p in params:
        ds = p["downsampling"]
        if p["shortcut"] is not None:
            ws, bns = p["shortcut"]
            residual = _ref_conv_bn(x, ws, bns, ds, False)
        else:
            residual = x
        h = _ref_conv_bn(x, p["w1"], p["bn1"], ds, True)
        h = _ref_conv_bn(h, p["w2"], p["bn2"], 1, False)
        x = h + residual
    return x


if __name__ == "__main__":
    key = jax.random.PRNGKey(0)
    kx, kp = jax.random.split(key)

    # batch=2, in_channels=4, out_channels=8, 16x16 spatial, n=2 blocks (NCHW).
    x = jax.random.normal(kx, (2, 4, 16, 16), jnp.float32)
    params = init_params(kp, in_channels=4, out_channels=8, n=2)

    out = resnet_layer_forward(x, params)
    out = jax.block_until_ready(out)
    assert out.shape == (2, 8, 8, 8), out.shape

    ref = _ref_layer(x, params)
    max_err = float(jnp.max(jnp.abs(out - ref)))
    # MXU operands are bf16 (matching what default-precision f32 dots do
    # internally), accumulated in f32, across ~5 chained contractions vs a
    # HIGHEST-precision f32 reference: agreement is bounded around ~1e-2.
    # Genuine layout/indexing bugs show up as O(0.1-1) errors, so 2e-2 is a
    # tight but robust gate.
    assert max_err < 2e-2, f"max abs diff vs reference: {max_err}"

    print("KERNEL_OK")
</pallas_src>

<mosaic_0001>
module attributes {stable_mosaic.version = 11 : i64} {
  func.func @kernel(%arg0: i32, %arg1: memref<1x8x512xf32, #tpu.memory_space<vmem>>, %arg2: memref<512x128xbf16, #tpu.memory_space<vmem>>, %arg3: memref<9x512xf32, #tpu.memory_space<vmem>>, %arg4: memref<9x128xf32, #tpu.memory_space<vmem>>, %arg5: memref<8x1xf32, #tpu.memory_space<vmem>>, %arg6: memref<8x1xf32, #tpu.memory_space<vmem>>, %arg7: memref<8x1xf32, #tpu.memory_space<vmem>>, %arg8: memref<8x1xf32, #tpu.memory_space<vmem>>, %arg9: memref<8x72xbf16, #tpu.memory_space<vmem>>, %arg10: memref<8x1xf32, #tpu.memory_space<vmem>>, %arg11: memref<8x1xf32, #tpu.memory_space<vmem>>, %arg12: memref<16x72xbf16, #tpu.memory_space<vmem>>, %arg13: memref<8x1xf32, #tpu.memory_space<vmem>>, %arg14: memref<8x1xf32, #tpu.memory_space<vmem>>, %arg15: memref<8x1xf32, #tpu.memory_space<vmem>>, %arg16: memref<8x1xf32, #tpu.memory_space<vmem>>, %arg17: memref<8x72xbf16, #tpu.memory_space<vmem>>, %arg18: memref<8x72xbf16, #tpu.memory_space<vmem>>, %arg19: memref<1x8x128xf32, #tpu.memory_space<vmem>>) attributes {dimension_semantics = [#tpu.dimension_semantics<parallel>], iteration_bounds = array<i64: 1>, scalar_prefetch = 0 : i64, scratch_operands = 0 : i64, tpu.core_type = #tpu.core_type<tc>, window_params = [{transform_indices = @transform_0, window_bounds = array<i64: 1, 8, 512>}, {pipeline_mode = #tpu.pipeline_mode<synchronous>, transform_indices = @transform_1, window_bounds = array<i64: 512, 128>}, {pipeline_mode = #tpu.pipeline_mode<synchronous>, transform_indices = @transform_2, window_bounds = array<i64: 9, 512>}, {pipeline_mode = #tpu.pipeline_mode<synchronous>, transform_indices = @transform_3, window_bounds = array<i64: 9, 128>}, {pipeline_mode = #tpu.pipeline_mode<synchronous>, transform_indices = @transform_4, window_bounds = array<i64: 8, 1>}, {pipeline_mode = #tpu.pipeline_mode<synchronous>, transform_indices = @transform_5, window_bounds = array<i64: 8, 1>}, {pipeline_mode = #tpu.pipeline_mode<synchronous>, transform_indices = @transform_6, window_bounds = array<i64: 8, 1>}, {pipeline_mode = #tpu.pipeline_mode<synchronous>, transform_indices = @transform_7, window_bounds = array<i64: 8, 1>}, {pipeline_mode = #tpu.pipeline_mode<synchronous>, transform_indices = @transform_8, window_bounds = array<i64: 8, 72>}, {pipeline_mode = #tpu.pipeline_mode<synchronous>, transform_indices = @transform_9, window_bounds = array<i64: 8, 1>}, {pipeline_mode = #tpu.pipeline_mode<synchronous>, transform_indices = @transform_10, window_bounds = array<i64: 8, 1>}, {pipeline_mode = #tpu.pipeline_mode<synchronous>, transform_indices = @transform_11, window_bounds = array<i64: 16, 72>}, {pipeline_mode = #tpu.pipeline_mode<synchronous>, transform_indices = @transform_12, window_bounds = array<i64: 8, 1>}, {pipeline_mode = #tpu.pipeline_mode<synchronous>, transform_indices = @transform_13, window_bounds = array<i64: 8, 1>}, {pipeline_mode = #tpu.pipeline_mode<synchronous>, transform_indices = @transform_14, window_bounds = array<i64: 8, 1>}, {pipeline_mode = #tpu.pipeline_mode<synchronous>, transform_indices = @transform_15, window_bounds = array<i64: 8, 1>}, {pipeline_mode = #tpu.pipeline_mode<synchronous>, transform_indices = @transform_16, window_bounds = array<i64: 8, 72>}, {pipeline_mode = #tpu.pipeline_mode<synchronous>, transform_indices = @transform_17, window_bounds = array<i64: 8, 72>}, {transform_indices = @transform_18, window_bounds = array<i64: 1, 8, 128>}]} {
    %c0 = arith.constant 0 : index
    %c0_0 = arith.constant 0 : index
    %c0_1 = arith.constant 0 : index
    %0 = vector.load %arg1[%c0, %c0_0, %c0_1] : memref<1x8x512xf32, #tpu.memory_space<vmem>>, vector<1x8x512xf32>
    %1 = vector.shape_cast %0 : vector<1x8x512xf32> to vector<8x512xf32>
    %c0_2 = arith.constant 0 : index
    %c0_3 = arith.constant 0 : index
    %2 = vector.load %arg3[%c0_2, %c0_3] : memref<9x512xf32, #tpu.memory_space<vmem>>, vector<9x512xf32>
    %c17_i32 = arith.constant 17 : i32
    %3 = tpu.dynamic_rotate %1 by %c17_i32 dim 1 : vector<8x512xf32>, i32 -> vector<8x512xf32>
    %4 = vector.extract_strided_slice %2 {offsets = [0, 0], sizes = [1, 512], strides = [1, 1]} : vector<9x512xf32> to vector<1x512xf32>
    %5 = vector.broadcast %4 : vector<1x512xf32> to vector<8x512xf32>
    %6 = arith.mulf %3, %5 : vector<8x512xf32>
    %c16_i32 = arith.constant 16 : i32
    %7 = tpu.dynamic_rotate %1 by %c16_i32 dim 1 : vector<8x512xf32>, i32 -> vector<8x512xf32>
    %8 = vector.extract_strided_slice %2 {offsets = [1, 0], sizes = [1, 512], strides = [1, 1]} : vector<9x512xf32> to vector<1x512xf32>
    %9 = vector.broadcast %8 : vector<1x512xf32> to vector<8x512xf32>
    %10 = arith.mulf %7, %9 : vector<8x512xf32>
    %c15_i32 = arith.constant 15 : i32
    %11 = tpu.dynamic_rotate %1 by %c15_i32 dim 1 : vector<8x512xf32>, i32 -> vector<8x512xf32>
    %12 = vector.extract_strided_slice %2 {offsets = [2, 0], sizes = [1, 512], strides = [1, 1]} : vector<9x512xf32> to vector<1x512xf32>
    %13 = vector.broadcast %12 : vector<1x512xf32> to vector<8x512xf32>
    %14 = arith.mulf %11, %13 : vector<8x512xf32>
    %c1_i32 = arith.constant 1 : i32
    %15 = tpu.dynamic_rotate %1 by %c1_i32 dim 1 : vector<8x512xf32>, i32 -> vector<8x512xf32>
    %16 = vector.extract_strided_slice %2 {offsets = [3, 0], sizes = [1, 512], strides = [1, 1]} : vector<9x512xf32> to vector<1x512xf32>
    %17 = vector.broadcast %16 : vector<1x512xf32> to vector<8x512xf32>
    %18 = arith.mulf %15, %17 : vector<8x512xf32>
    %c511_i32 = arith.constant 511 : i32
    %19 = tpu.dynamic_rotate %1 by %c511_i32 dim 1 : vector<8x512xf32>, i32 -> vector<8x512xf32>
    %20 = vector.extract_strided_slice %2 {offsets = [5, 0], sizes = [1, 512], strides = [1, 1]} : vector<9x512xf32> to vector<1x512xf32>
    %21 = vector.broadcast %20 : vector<1x512xf32> to vector<8x512xf32>
    %22 = arith.mulf %19, %21 : vector<8x512xf32>
    %c497_i32 = arith.constant 497 : i32
    %23 = tpu.dynamic_rotate %1 by %c497_i32 dim 1 : vector<8x512xf32>, i32 -> vector<8x512xf32>
    %24 = vector.extract_strided_slice %2 {offsets = [6, 0], sizes = [1, 512], strides = [1, 1]} : vector<9x512xf32> to vector<1x512xf32>
    %25 = vector.broadcast %24 : vector<1x512xf32> to vector<8x512xf32>
    %26 = arith.mulf %23, %25 : vector<8x512xf32>
    %c496_i32 = arith.constant 496 : i32
    %27 = tpu.dynamic_rotate %1 by %c496_i32 dim 1 : vector<8x512xf32>, i32 -> vector<8x512xf32>
    %28 = vector.extract_strided_slice %2 {offsets = [7, 0], sizes = [1, 512], strides = [1, 1]} : vector<9x512xf32> to vector<1x512xf32>
    %29 = vector.broadcast %28 : vector<1x512xf32> to vector<8x512xf32>
    %30 = arith.mulf %27, %29 : vector<8x512xf32>
    %c495_i32 = arith.constant 495 : i32
    %31 = tpu.dynamic_rotate %1 by %c495_i32 dim 1 : vector<8x512xf32>, i32 -> vector<8x512xf32>
    %32 = vector.extract_strided_slice %2 {offsets = [8, 0], sizes = [1, 512], strides = [1, 1]} : vector<9x512xf32> to vector<1x512xf32>
    %33 = vector.broadcast %32 : vector<1x512xf32> to vector<8x512xf32>
    %34 = arith.mulf %31, %33 : vector<8x512xf32>
    %35 = tpu.concatenate %6, %10, %14, %18, %1, %22, %26, %30, %34 in 0 : vector<8x512xf32>, vector<8x512xf32>, vector<8x512xf32>, vector<8x512xf32>, vector<8x512xf32>, vector<8x512xf32>, vector<8x512xf32>, vector<8x512xf32>, vector<8x512xf32> -> vector<72x512xf32>
    %36 = arith.truncf %35 : vector<72x512xf32> to vector<72x512xbf16>
    %c0_4 = arith.constant 0 : index
    %c0_5 = arith.constant 0 : index
    %37 = vector.load %arg12[%c0_4, %c0_5] : memref<16x72xbf16, #tpu.memory_space<vmem>>, vector<16x72xbf16>
    %cst = arith.constant dense<0.000000e+00> : vector<16x512xf32>
    %38 = tpu.matmul %37, %36, %cst {dimension_numbers = #tpu.dot_dimension_numbers<[1], [0], [0], [1], [0, 0, 1, 1], [], []>} : vector<16x72xbf16>, vector<72x512xbf16>, vector<16x512xf32> -> vector<16x512xf32>
    %39 = arith.truncf %38 : vector<16x512xf32> to vector<16x512xbf16>
    %c0_6 = arith.constant 0 : index
    %c0_7 = arith.constant 0 : index
    %40 = vector.load %arg2[%c0_6, %c0_7] : memref<512x128xbf16, #tpu.memory_space<vmem>>, vector<512x128xbf16>
    %cst_8 = arith.constant dense<0.000000e+00> : vector<16x128xf32>
    %41 = tpu.matmul %39, %40, %cst_8 {dimension_numbers = #tpu.dot_dimension_numbers<[1], [0], [0], [1], [0, 0, 1, 1], [], []>} : vector<16x512xbf16>, vector<512x128xbf16>, vector<16x128xf32> -> vector<16x128xf32>
    %42 = vector.extract_strided_slice %41 {offsets = [8, 0], sizes = [8, 128], strides = [1, 1]} : vector<16x128xf32> to vector<8x128xf32>
    %c0_9 = arith.constant 0 : index
    %c0_10 = arith.constant 0 : index
    %43 = vector.load %arg10[%c0_9, %c0_10] : memref<8x1xf32, #tpu.memory_space<vmem>>, vector<8x1xf32>
    %44 = vector.broadcast %43 : vector<8x1xf32> to vector<8x128xf32>
    %45 = arith.mulf %42, %44 : vector<8x128xf32>
    %c0_11 = arith.constant 0 : index
    %c0_12 = arith.constant 0 : index
    %46 = vector.load %arg11[%c0_11, %c0_12] : memref<8x1xf32, #tpu.memory_space<vmem>>, vector<8x1xf32>
    %47 = vector.broadcast %46 : vector<8x1xf32> to vector<8x128xf32>
    %48 = arith.addf %45, %47 : vector<8x128xf32>
    %49 = vector.extract_strided_slice %41 {offsets = [0, 0], sizes = [8, 128], strides = [1, 1]} : vector<16x128xf32> to vector<8x128xf32>
    %c0_13 = arith.constant 0 : index
    %c0_14 = arith.constant 0 : index
    %50 = vector.load %arg5[%c0_13, %c0_14] : memref<8x1xf32, #tpu.memory_space<vmem>>, vector<8x1xf32>
    %51 = vector.broadcast %50 : vector<8x1xf32> to vector<8x128xf32>
    %52 = arith.mulf %49, %51 : vector<8x128xf32>
    %c0_15 = arith.constant 0 : index
    %c0_16 = arith.constant 0 : index
    %53 = vector.load %arg6[%c0_15, %c0_16] : memref<8x1xf32, #tpu.memory_space<vmem>>, vector<8x1xf32>
    %54 = vector.broadcast %53 : vector<8x1xf32> to vector<8x128xf32>
    %55 = arith.addf %52, %54 : vector<8x128xf32>
    %cst_17 = arith.constant 0.000000e+00 : f32
    %56 = vector.broadcast %cst_17 : f32 to vector<8x128xf32>
    %57 = arith.maximumf %55, %56 : vector<8x128xf32>
    %c0_18 = arith.constant 0 : index
    %c0_19 = arith.constant 0 : index
    %58 = vector.load %arg4[%c0_18, %c0_19] : memref<9x128xf32, #tpu.memory_space<vmem>>, vector<9x128xf32>
    %c9_i32 = arith.constant 9 : i32
    %59 = tpu.dynamic_rotate %57 by %c9_i32 dim 1 : vector<8x128xf32>, i32 -> vector<8x128xf32>
    %60 = vector.extract_strided_slice %58 {offsets = [0, 0], sizes = [1, 128], strides = [1, 1]} : vector<9x128xf32> to vector<1x128xf32>
    %61 = vector.broadcast %60 : vector<1x128xf32> to vector<8x128xf32>
    %62 = arith.mulf %59, %61 : vector<8x128xf32>
    %c8_i32 = arith.constant 8 : i32
    %63 = tpu.dynamic_rotate %57 by %c8_i32 dim 1 : vector<8x128xf32>, i32 -> vector<8x128xf32>
    %64 = vector.extract_strided_slice %58 {offsets = [1, 0], sizes = [1, 128], strides = [1, 1]} : vector<9x128xf32> to vector<1x128xf32>
    %65 = vector.broadcast %64 : vector<1x128xf32> to vector<8x128xf32>
    %66 = arith.mulf %63, %65 : vector<8x128xf32>
    %c7_i32 = arith.constant 7 : i32
    %67 = tpu.dynamic_rotate %57 by %c7_i32 dim 1 : vector<8x128xf32>, i32 -> vector<8x128xf32>
    %68 = vector.extract_strided_slice %58 {offsets = [2, 0], sizes = [1, 128], strides = [1, 1]} : vector<9x128xf32> to vector<1x128xf32>
    %69 = vector.broadcast %68 : vector<1x128xf32> to vector<8x128xf32>
    %70 = arith.mulf %67, %69 : vector<8x128xf32>
    %c1_i32_20 = arith.constant 1 : i32
    %71 = tpu.dynamic_rotate %57 by %c1_i32_20 dim 1 : vector<8x128xf32>, i32 -> vector<8x128xf32>
    %72 = vector.extract_strided_slice %58 {offsets = [3, 0], sizes = [1, 128], strides = [1, 1]} : vector<9x128xf32> to vector<1x128xf32>
    %73 = vector.broadcast %72 : vector<1x128xf32> to vector<8x128xf32>
    %74 = arith.mulf %71, %73 : vector<8x128xf32>
    %c127_i32 = arith.constant 127 : i32
    %75 = tpu.dynamic_rotate %57 by %c127_i32 dim 1 : vector<8x128xf32>, i32 -> vector<8x128xf32>
    %76 = vector.extract_strided_slice %58 {offsets = [5, 0], sizes = [1, 128], strides = [1, 1]} : vector<9x128xf32> to vector<1x128xf32>
    %77 = vector.broadcast %76 : vector<1x128xf32> to vector<8x128xf32>
    %78 = arith.mulf %75, %77 : vector<8x128xf32>
    %c121_i32 = arith.constant 121 : i32
    %79 = tpu.dynamic_rotate %57 by %c121_i32 dim 1 : vector<8x128xf32>, i32 -> vector<8x128xf32>
    %80 = vector.extract_strided_slice %58 {offsets = [6, 0], sizes = [1, 128], strides = [1, 1]} : vector<9x128xf32> to vector<1x128xf32>
    %81 = vector.broadcast %80 : vector<1x128xf32> to vector<8x128xf32>
    %82 = arith.mulf %79, %81 : vector<8x128xf32>
    %c120_i32 = arith.constant 120 : i32
    %83 = tpu.dynamic_rotate %57 by %c120_i32 dim 1 : vector<8x128xf32>, i32 -> vector<8x128xf32>
    %84 = vector.extract_strided_slice %58 {offsets = [7, 0], sizes = [1, 128], strides = [1, 1]} : vector<9x128xf32> to vector<1x128xf32>
    %85 = vector.broadcast %84 : vector<1x128xf32> to vector<8x128xf32>
    %86 = arith.mulf %83, %85 : vector<8x128xf32>
    %c119_i32 = arith.constant 119 : i32
    %87 = tpu.dynamic_rotate %57 by %c119_i32 dim 1 : vector<8x128xf32>, i32 -> vector<8x128xf32>
    %88 = vector.extract_strided_slice %58 {offsets = [8, 0], sizes = [1, 128], strides = [1, 1]} : vector<9x128xf32> to vector<1x128xf32>
    %89 = vector.broadcast %88 : vector<1x128xf32> to vector<8x128xf32>
    %90 = arith.mulf %87, %89 : vector<8x128xf32>
    %91 = tpu.concatenate %62, %66, %70, %74, %57, %78, %82, %86, %90 in 0 : vector<8x128xf32>, vector<8x128xf32>, vector<8x128xf32>, vector<8x128xf32>, vector<8x128xf32>, vector<8x128xf32>, vector<8x128xf32>, vector<8x128xf32>, vector<8x128xf32> -> vector<72x128xf32>
    %92 = arith.truncf %91 : vector<72x128xf32> to vector<72x128xbf16>
    %c0_21 = arith.constant 0 : index
    %c0_22 = arith.constant 0 : index
    %93 = vector.load %arg9[%c0_21, %c0_22] : memref<8x72xbf16, #tpu.memory_space<vmem>>, vector<8x72xbf16>
    %cst_23 = arith.constant dense<0.000000e+00> : vector<8x128xf32>
    %94 = tpu.matmul %93, %92, %cst_23 {dimension_numbers = #tpu.dot_dimension_numbers<[1], [0], [0], [1], [0, 0, 1, 1], [], []>} : vector<8x72xbf16>, vector<72x128xbf16>, vector<8x128xf32> -> vector<8x128xf32>
    %c0_24 = arith.constant 0 : index
    %c0_25 = arith.constant 0 : index
    %95 = vector.load %arg7[%c0_24, %c0_25] : memref<8x1xf32, #tpu.memory_space<vmem>>, vector<8x1xf32>
    %96 = vector.broadcast %95 : vector<8x1xf32> to vector<8x128xf32>
    %97 = arith.mulf %94, %96 : vector<8x128xf32>
    %c0_26 = arith.constant 0 : index
    %c0_27 = arith.constant 0 : index
    %98 = vector.load %arg8[%c0_26, %c0_27] : memref<8x1xf32, #tpu.memory_space<vmem>>, vector<8x1xf32>
    %99 = vector.broadcast %98 : vector<8x1xf32> to vector<8x128xf32>
    %100 = arith.addf %97, %99 : vector<8x128xf32>
    %101 = arith.addf %100, %48 : vector<8x128xf32>
    %c0_28 = arith.constant 0 : index
    %c0_29 = arith.constant 0 : index
    %102 = vector.load %arg4[%c0_28, %c0_29] : memref<9x128xf32, #tpu.memory_space<vmem>>, vector<9x128xf32>
    %c9_i32_30 = arith.constant 9 : i32
    %103 = tpu.dynamic_rotate %101 by %c9_i32_30 dim 1 : vector<8x128xf32>, i32 -> vector<8x128xf32>
    %104 = vector.extract_strided_slice %102 {offsets = [0, 0], sizes = [1, 128], strides = [1, 1]} : vector<9x128xf32> to vector<1x128xf32>
    %105 = vector.broadcast %104 : vector<1x128xf32> to vector<8x128xf32>
    %106 = arith.mulf %103, %105 : vector<8x128xf32>
    %c8_i32_31 = arith.constant 8 : i32
    %107 = tpu.dynamic_rotate %101 by %c8_i32_31 dim 1 : vector<8x128xf32>, i32 -> vector<8x128xf32>
    %108 = vector.extract_strided_slice %102 {offsets = [1, 0], sizes = [1, 128], strides = [1, 1]} : vector<9x128xf32> to vector<1x128xf32>
    %109 = vector.broadcast %108 : vector<1x128xf32> to vector<8x128xf32>
    %110 = arith.mulf %107, %109 : vector<8x128xf32>
    %c7_i32_32 = arith.constant 7 : i32
    %111 = tpu.dynamic_rotate %101 by %c7_i32_32 dim 1 : vector<8x128xf32>, i32 -> vector<8x128xf32>
    %112 = vector.extract_strided_slice %102 {offsets = [2, 0], sizes = [1, 128], strides = [1, 1]} : vector<9x128xf32> to vector<1x128xf32>
    %113 = vector.broadcast %112 : vector<1x128xf32> to vector<8x128xf32>
    %114 = arith.mulf %111, %113 : vector<8x128xf32>
    %c1_i32_33 = arith.constant 1 : i32
    %115 = tpu.dynamic_rotate %101 by %c1_i32_33 dim 1 : vector<8x128xf32>, i32 -> vector<8x128xf32>
    %116 = vector.extract_strided_slice %102 {offsets = [3, 0], sizes = [1, 128], strides = [1, 1]} : vector<9x128xf32> to vector<1x128xf32>
    %117 = vector.broadcast %116 : vector<1x128xf32> to vector<8x128xf32>
    %118 = arith.mulf %115, %117 : vector<8x128xf32>
    %c127_i32_34 = arith.constant 127 : i32
    %119 = tpu.dynamic_rotate %101 by %c127_i32_34 dim 1 : vector<8x128xf32>, i32 -> vector<8x128xf32>
    %120 = vector.extract_strided_slice %102 {offsets = [5, 0], sizes = [1, 128], strides = [1, 1]} : vector<9x128xf32> to vector<1x128xf32>
    %121 = vector.broadcast %120 : vector<1x128xf32> to vector<8x128xf32>
    %122 = arith.mulf %119, %121 : vector<8x128xf32>
    %c121_i32_35 = arith.constant 121 : i32
    %123 = tpu.dynamic_rotate %101 by %c121_i32_35 dim 1 : vector<8x128xf32>, i32 -> vector<8x128xf32>
    %124 = vector.extract_strided_slice %102 {offsets = [6, 0], sizes = [1, 128], strides = [1, 1]} : vector<9x128xf32> to vector<1x128xf32>
    %125 = vector.broadcast %124 : vector<1x128xf32> to vector<8x128xf32>
    %126 = arith.mulf %123, %125 : vector<8x128xf32>
    %c120_i32_36 = arith.constant 120 : i32
    %127 = tpu.dynamic_rotate %101 by %c120_i32_36 dim 1 : vector<8x128xf32>, i32 -> vector<8x128xf32>
    %128 = vector.extract_strided_slice %102 {offsets = [7, 0], sizes = [1, 128], strides = [1, 1]} : vector<9x128xf32> to vector<1x128xf32>
    %129 = vector.broadcast %128 : vector<1x128xf32> to vector<8x128xf32>
    %130 = arith.mulf %127, %129 : vector<8x128xf32>
    %c119_i32_37 = arith.constant 119 : i32
    %131 = tpu.dynamic_rotate %101 by %c119_i32_37 dim 1 : vector<8x128xf32>, i32 -> vector<8x128xf32>
    %132 = vector.extract_strided_slice %102 {offsets = [8, 0], sizes = [1, 128], strides = [1, 1]} : vector<9x128xf32> to vector<1x128xf32>
    %133 = vector.broadcast %132 : vector<1x128xf32> to vector<8x128xf32>
    %134 = arith.mulf %131, %133 : vector<8x128xf32>
    %135 = tpu.concatenate %106, %110, %114, %118, %101, %122, %126, %130, %134 in 0 : vector<8x128xf32>, vector<8x128xf32>, vector<8x128xf32>, vector<8x128xf32>, vector<8x128xf32>, vector<8x128xf32>, vector<8x128xf32>, vector<8x128xf32>, vector<8x128xf32> -> vector<72x128xf32>
    %136 = arith.truncf %135 : vector<72x128xf32> to vector<72x128xbf16>
    %c0_38 = arith.constant 0 : index
    %c0_39 = arith.constant 0 : index
    %137 = vector.load %arg18[%c0_38, %c0_39] : memref<8x72xbf16, #tpu.memory_space<vmem>>, vector<8x72xbf16>
    %cst_40 = arith.constant dense<0.000000e+00> : vector<8x128xf32>
    %138 = tpu.matmul %137, %136, %cst_40 {dimension_numbers = #tpu.dot_dimension_numbers<[1], [0], [0], [1], [0, 0, 1, 1], [], []>} : vector<8x72xbf16>, vector<72x128xbf16>, vector<8x128xf32> -> vector<8x128xf32>
    %c0_41 = arith.constant 0 : index
    %c0_42 = arith.constant 0 : index
    %139 = vector.load %arg13[%c0_41, %c0_42] : memref<8x1xf32, #tpu.memory_space<vmem>>, vector<8x1xf32>
    %140 = vector.broadcast %139 : vector<8x1xf32> to vector<8x128xf32>
    %141 = arith.mulf %138, %140 : vector<8x128xf32>
    %c0_43 = arith.constant 0 : index
    %c0_44 = arith.constant 0 : index
    %142 = vector.load %arg14[%c0_43, %c0_44] : memref<8x1xf32, #tpu.memory_space<vmem>>, vector<8x1xf32>
    %143 = vector.broadcast %142 : vector<8x1xf32> to vector<8x128xf32>
    %144 = arith.addf %141, %143 : vector<8x128xf32>
    %cst_45 = arith.constant 0.000000e+00 : f32
    %145 = vector.broadcast %cst_45 : f32 to vector<8x128xf32>
    %146 = arith.maximumf %144, %145 : vector<8x128xf32>
    %c0_46 = arith.constant 0 : index
    %c0_47 = arith.constant 0 : index
    %147 = vector.load %arg4[%c0_46, %c0_47] : memref<9x128xf32, #tpu.memory_space<vmem>>, vector<9x128xf32>
    %c9_i32_48 = arith.constant 9 : i32
    %148 = tpu.dynamic_rotate %146 by %c9_i32_48 dim 1 : vector<8x128xf32>, i32 -> vector<8x128xf32>
    %149 = vector.extract_strided_slice %147 {offsets = [0, 0], sizes = [1, 128], strides = [1, 1]} : vector<9x128xf32> to vector<1x128xf32>
    %150 = vector.broadcast %149 : vector<1x128xf32> to vector<8x128xf32>
    %151 = arith.mulf %148, %150 : vector<8x128xf32>
    %c8_i32_49 = arith.constant 8 : i32
    %152 = tpu.dynamic_rotate %146 by %c8_i32_49 dim 1 : vector<8x128xf32>, i32 -> vector<8x128xf32>
    %153 = vector.extract_strided_slice %147 {offsets = [1, 0], sizes = [1, 128], strides = [1, 1]} : vector<9x128xf32> to vector<1x128xf32>
    %154 = vector.broadcast %153 : vector<1x128xf32> to vector<8x128xf32>
    %155 = arith.mulf %152, %154 : vector<8x128xf32>
    %c7_i32_50 = arith.constant 7 : i32
    %156 = tpu.dynamic_rotate %146 by %c7_i32_50 dim 1 : vector<8x128xf32>, i32 -> vector<8x128xf32>
    %157 = vector.extract_strided_slice %147 {offsets = [2, 0], sizes = [1, 128], strides = [1, 1]} : vector<9x128xf32> to vector<1x128xf32>
    %158 = vector.broadcast %157 : vector<1x128xf32> to vector<8x128xf32>
    %159 = arith.mulf %156, %158 : vector<8x128xf32>
    %c1_i32_51 = arith.constant 1 : i32
    %160 = tpu.dynamic_rotate %146 by %c1_i32_51 dim 1 : vector<8x128xf32>, i32 -> vector<8x128xf32>
    %161 = vector.extract_strided_slice %147 {offsets = [3, 0], sizes = [1, 128], strides = [1, 1]} : vector<9x128xf32> to vector<1x128xf32>
    %162 = vector.broadcast %161 : vector<1x128xf32> to vector<8x128xf32>
    %163 = arith.mulf %160, %162 : vector<8x128xf32>
    %c127_i32_52 = arith.constant 127 : i32
    %164 = tpu.dynamic_rotate %146 by %c127_i32_52 dim 1 : vector<8x128xf32>, i32 -> vector<8x128xf32>
    %165 = vector.extract_strided_slice %147 {offsets = [5, 0], sizes = [1, 128], strides = [1, 1]} : vector<9x128xf32> to vector<1x128xf32>
    %166 = vector.broadcast %165 : vector<1x128xf32> to vector<8x128xf32>
    %167 = arith.mulf %164, %166 : vector<8x128xf32>
    %c121_i32_53 = arith.constant 121 : i32
    %168 = tpu.dynamic_rotate %146 by %c121_i32_53 dim 1 : vector<8x128xf32>, i32 -> vector<8x128xf32>
    %169 = vector.extract_strided_slice %147 {offsets = [6, 0], sizes = [1, 128], strides = [1, 1]} : vector<9x128xf32> to vector<1x128xf32>
    %170 = vector.broadcast %169 : vector<1x128xf32> to vector<8x128xf32>
    %171 = arith.mulf %168, %170 : vector<8x128xf32>
    %c120_i32_54 = arith.constant 120 : i32
    %172 = tpu.dynamic_rotate %146 by %c120_i32_54 dim 1 : vector<8x128xf32>, i32 -> vector<8x128xf32>
    %173 = vector.extract_strided_slice %147 {offsets = [7, 0], sizes = [1, 128], strides = [1, 1]} : vector<9x128xf32> to vector<1x128xf32>
    %174 = vector.broadcast %173 : vector<1x128xf32> to vector<8x128xf32>
    %175 = arith.mulf %172, %174 : vector<8x128xf32>
    %c119_i32_55 = arith.constant 119 : i32
    %176 = tpu.dynamic_rotate %146 by %c119_i32_55 dim 1 : vector<8x128xf32>, i32 -> vector<8x128xf32>
    %177 = vector.extract_strided_slice %147 {offsets = [8, 0], sizes = [1, 128], strides = [1, 1]} : vector<9x128xf32> to vector<1x128xf32>
    %178 = vector.broadcast %177 : vector<1x128xf32> to vector<8x128xf32>
    %179 = arith.mulf %176, %178 : vector<8x128xf32>
    %180 = tpu.concatenate %151, %155, %159, %163, %146, %167, %171, %175, %179 in 0 : vector<8x128xf32>, vector<8x128xf32>, vector<8x128xf32>, vector<8x128xf32>, vector<8x128xf32>, vector<8x128xf32>, vector<8x128xf32>, vector<8x128xf32>, vector<8x128xf32> -> vector<72x128xf32>
    %181 = arith.truncf %180 : vector<72x128xf32> to vector<72x128xbf16>
    %c0_56 = arith.constant 0 : index
    %c0_57 = arith.constant 0 : index
    %182 = vector.load %arg17[%c0_56, %c0_57] : memref<8x72xbf16, #tpu.memory_space<vmem>>, vector<8x72xbf16>
    %cst_58 = arith.constant dense<0.000000e+00> : vector<8x128xf32>
    %183 = tpu.matmul %182, %181, %cst_58 {dimension_numbers = #tpu.dot_dimension_numbers<[1], [0], [0], [1], [0, 0, 1, 1], [], []>} : vector<8x72xbf16>, vector<72x128xbf16>, vector<8x128xf32> -> vector<8x128xf32>
    %c0_59 = arith.constant 0 : index
    %c0_60 = arith.constant 0 : index
    %184 = vector.load %arg15[%c0_59, %c0_60] : memref<8x1xf32, #tpu.memory_space<vmem>>, vector<8x1xf32>
    %185 = vector.broadcast %184 : vector<8x1xf32> to vector<8x128xf32>
    %186 = arith.mulf %183, %185 : vector<8x128xf32>
    %c0_61 = arith.constant 0 : index
    %c0_62 = arith.constant 0 : index
    %187 = vector.load %arg16[%c0_61, %c0_62] : memref<8x1xf32, #tpu.memory_space<vmem>>, vector<8x1xf32>
    %188 = vector.broadcast %187 : vector<8x1xf32> to vector<8x128xf32>
    %189 = arith.addf %186, %188 : vector<8x128xf32>
    %190 = arith.addf %189, %101 : vector<8x128xf32>
    %c0_63 = arith.constant 0 : index
    %c0_64 = arith.constant 0 : index
    %c0_65 = arith.constant 0 : index
    %191 = vector.load %arg19[%c0_63, %c0_64, %c0_65] : memref<1x8x128xf32, #tpu.memory_space<vmem>>, vector<1x8x128xf32>
    %192 = vector.shape_cast %191 : vector<1x8x128xf32> to vector<8x128xf32>
    %193 = vector.shape_cast %190 : vector<8x128xf32> to vector<1x8x128xf32>
    tpu.vector_store %arg19[%c0_63, %c0_64, %c0_65], %193 {strides = array<i32>} : memref<1x8x128xf32, #tpu.memory_space<vmem>>, vector<1x8x128xf32>,
    return
  }
  func.func @transform_0(%arg0: i32) -> (i32, i32, i32) {
    %c0_i32 = arith.constant 0 : i32
    %c0_i32_0 = arith.constant 0 : i32
    %c0_i32_1 = arith.constant 0 : i32
    return %arg0, %c0_i32, %c0_i32_0 : i32, i32, i32
  }
  func.func @transform_1(%arg0: i32) -> (i32, i32) {
    %c0_i32 = arith.constant 0 : i32
    %c0_i32_0 = arith.constant 0 : i32
    %c0_i32_1 = arith.constant 0 : i32
    return %c0_i32, %c0_i32_0 : i32, i32
  }
  func.func @transform_2(%arg0: i32) -> (i32, i32) {
    %c0_i32 = arith.constant 0 : i32
    %c0_i32_0 = arith.constant 0 : i32
    %c0_i32_1 = arith.constant 0 : i32
    return %c0_i32, %c0_i32_0 : i32, i32
  }
  func.func @transform_3(%arg0: i32) -> (i32, i32) {
    %c0_i32 = arith.constant 0 : i32
    %c0_i32_0 = arith.constant 0 : i32
    %c0_i32_1 = arith.constant 0 : i32
    return %c0_i32, %c0_i32_0 : i32, i32
  }
  func.func @transform_4(%arg0: i32) -> (i32, i32) {
    %c0_i32 = arith.constant 0 : i32
    %c0_i32_0 = arith.constant 0 : i32
    %c0_i32_1 = arith.constant 0 : i32
    return %c0_i32, %c0_i32_0 : i32, i32
  }
  func.func @transform_5(%arg0: i32) -> (i32, i32) {
    %c0_i32 = arith.constant 0 : i32
    %c0_i32_0 = arith.constant 0 : i32
    %c0_i32_1 = arith.constant 0 : i32
    return %c0_i32, %c0_i32_0 : i32, i32
  }
  func.func @transform_6(%arg0: i32) -> (i32, i32) {
    %c0_i32 = arith.constant 0 : i32
    %c0_i32_0 = arith.constant 0 : i32
    %c0_i32_1 = arith.constant 0 : i32
    return %c0_i32, %c0_i32_0 : i32, i32
  }
  func.func @transform_7(%arg0: i32) -> (i32, i32) {
    %c0_i32 = arith.constant 0 : i32
    %c0_i32_0 = arith.constant 0 : i32
    %c0_i32_1 = arith.constant 0 : i32
    return %c0_i32, %c0_i32_0 : i32, i32
  }
  func.func @transform_8(%arg0: i32) -> (i32, i32) {
    %c0_i32 = arith.constant 0 : i32
    %c0_i32_0 = arith.constant 0 : i32
    %c0_i32_1 = arith.constant 0 : i32
    return %c0_i32, %c0_i32_0 : i32, i32
  }
  func.func @transform_9(%arg0: i32) -> (i32, i32) {
    %c0_i32 = arith.constant 0 : i32
    %c0_i32_0 = arith.constant 0 : i32
    %c0_i32_1 = arith.constant 0 : i32
    return %c0_i32, %c0_i32_0 : i32, i32
  }
  func.func @transform_10(%arg0: i32) -> (i32, i32) {
    %c0_i32 = arith.constant 0 : i32
    %c0_i32_0 = arith.constant 0 : i32
    %c0_i32_1 = arith.constant 0 : i32
    return %c0_i32, %c0_i32_0 : i32, i32
  }
  func.func @transform_11(%arg0: i32) -> (i32, i32) {
    %c0_i32 = arith.constant 0 : i32
    %c0_i32_0 = arith.constant 0 : i32
    %c0_i32_1 = arith.constant 0 : i32
    return %c0_i32, %c0_i32_0 : i32, i32
  }
  func.func @transform_12(%arg0: i32) -> (i32, i32) {
    %c0_i32 = arith.constant 0 : i32
    %c0_i32_0 = arith.constant 0 : i32
    %c0_i32_1 = arith.constant 0 : i32
    return %c0_i32, %c0_i32_0 : i32, i32
  }
  func.func @transform_13(%arg0: i32) -> (i32, i32) {
    %c0_i32 = arith.constant 0 : i32
    %c0_i32_0 = arith.constant 0 : i32
    %c0_i32_1 = arith.constant 0 : i32
    return %c0_i32, %c0_i32_0 : i32, i32
  }
  func.func @transform_14(%arg0: i32) -> (i32, i32) {
    %c0_i32 = arith.constant 0 : i32
    %c0_i32_0 = arith.constant 0 : i32
    %c0_i32_1 = arith.constant 0 : i32
    return %c0_i32, %c0_i32_0 : i32, i32
  }
  func.func @transform_15(%arg0: i32) -> (i32, i32) {
    %c0_i32 = arith.constant 0 : i32
    %c0_i32_0 = arith.constant 0 : i32
    %c0_i32_1 = arith.constant 0 : i32
    return %c0_i32, %c0_i32_0 : i32, i32
  }
  func.func @transform_16(%arg0: i32) -> (i32, i32) {
    %c0_i32 = arith.constant 0 : i32
    %c0_i32_0 = arith.constant 0 : i32
    %c0_i32_1 = arith.constant 0 : i32
    return %c0_i32, %c0_i32_0 : i32, i32
  }
  func.func @transform_17(%arg0: i32) -> (i32, i32) {
    %c0_i32 = arith.constant 0 : i32
    %c0_i32_0 = arith.constant 0 : i32
    %c0_i32_1 = arith.constant 0 : i32
    return %c0_i32, %c0_i32_0 : i32, i32
  }
  func.func @transform_18(%arg0: i32) -> (i32, i32, i32) {
    %c0_i32 = arith.constant 0 : i32
    %c0_i32_0 = arith.constant 0 : i32
    %c0_i32_1 = arith.constant 0 : i32
    return %arg0, %c0_i32, %c0_i32_0 : i32, i32, i32
  }
}

</mosaic_0001>

<bundles_post_ra>
// kernel: tpu_custom_call.1
= control target key start
LH: loop header
LB: loop body
LE: loop exit
PB: predicated region body
PF: predicated region fallthrough
CT: control target
= control target key end

     0   :  { %s1743_s0 = inlined_call_operand.hbm [shape: f32[1,8,512], index: 0, kind: input, shape index: {}]   ;;  %s1744_s1 = inlined_call_operand.hbm [shape: bf16[512,128], index: 1, kind: input, shape index: {}]   ;;  %s1745_s2 = inlined_call_operand.hbm [shape: f32[9,512], index: 2, kind: input, shape index: {}]   ;;  %s1746_s3 = inlined_call_operand.vmem [shape: f32[9,128], index: 3, kind: input, shape index: {}]   ;;  %s1747_s4 = inlined_call_operand.vmem [shape: f32[8,1], index: 4, kind: input, shape index: {}]   ;;  %s1748_s5 = inlined_call_operand.vmem [shape: f32[8,1], index: 5, kind: input, shape index: {}]   ;;  %s1749_s6 = inlined_call_operand.vmem [shape: f32[8,1], index: 6, kind: input, shape index: {}]   ;;  %s1750_s7 = inlined_call_operand.vmem [shape: f32[8,1], index: 7, kind: input, shape index: {}]   ;;  %s1751_s8 = inlined_call_operand.vmem [shape: bf16[8,72], index: 8, kind: input, shape index: {}]   ;;  %s1752_s9 = inlined_call_operand.vmem [shape: f32[8,1], index: 9, kind: input, shape index: {}]   ;;  %s1753_s10 = inlined_call_operand.vmem [shape: f32[8,1], index: 10, kind: input, shape index: {}]   ;;  %s1754_s11 = inlined_call_operand.vmem [shape: bf16[16,72], index: 11, kind: input, shape index: {}]   ;;  %s1755_s12 = inlined_call_operand.vmem [shape: f32[8,1], index: 12, kind: input, shape index: {}]   ;;  %s1756_s13 = inlined_call_operand.vmem [shape: f32[8,1], index: 13, kind: input, shape index: {}]   ;;  %s1757_s14 = inlined_call_operand.vmem [shape: f32[8,1], index: 14, kind: input, shape index: {}]   ;;  %s1758_s15 = inlined_call_operand.vmem [shape: f32[8,1], index: 15, kind: input, shape index: {}]   ;;  %s1759_s16 = inlined_call_operand.vmem [shape: bf16[8,72], index: 16, kind: input, shape index: {}]   ;;  %s1760_s17 = inlined_call_operand.vmem [shape: bf16[8,72], index: 17, kind: input, shape index: {}]   ;;  %s1761_s18 = inlined_call_operand.hbm [shape: f32[1,8,128], index: 18, kind: output, shape index: {}]  }
   0x1   :  { %1762 = sst [smem:[#allocation12_spill]] %s1743_s0 }
   0x2   :  { %1763 = sst [smem:[#allocation13_spill]] %s1744_s1 }
   0x3   :  { %1764 = sst [smem:[#allocation14_spill]] %s1745_s2 }
   0x4   :  { %1765 = sst [smem:[#allocation15_spill]] %s1758_s15 }
   0x5   :  { %1766 = sst [smem:[#allocation16_spill]] %s1759_s16 }
   0x6   :  { %1767 = sst [smem:[#allocation17_spill]] %s1761_s18 }
   0x7   :  { %23 = vsyncpa [#allocation3], 0 }
   0x8   :  { %24 = vsyncpa [#allocation6], 0  ;;  %s1768_s29 = sld [smem:[#allocation13_spill]] }
   0xe   :  { %s41_s30 = sshll.u32 %s1768_s29, 4  ;;  %s42_s30 = int_to_ptr.hbm [resolvable:$true] %s41_s30 }
   0xf   :  { %25 = vsyncpa [#allocation4], 0  ;;  %s1259_s0 = smov [#allocation5]   ;;  %s1769_s21 = sld [smem:[#allocation12_spill]] }
  0x10   :  { %s43_s19 = sshll.u32 %s1259_s0, 4  ;;  %s1260_s2 = smov 64   ;;  %s44_s19 = int_to_ptr.vmem [resolvable:$true] %s43_s19 }
  0x11   :  { %s1261_s23 = smov 4   ;;  %s1262_s24 = smov [#allocation2]  }
  0x12   :  { %49 = dma.hbm_to_vmem [thread:$0]  %s42_s30, 4096, %s44_s19, [#allocation6], %s1260_s2, %s1260_s2, %s1261_s23  }
  0x13   :  { %s33_s25 = sshll.u32 %s1262_s24, 4  ;;  %s1770_s16 = sld [smem:[#allocation14_spill]]  ;;  %s34_s25 = int_to_ptr.vmem [resolvable:$true] %s33_s25 }
  0x14   :  { %s1263_s28 = smov [#allocation7]   ;;  %s1264_s0 = smov 512  }
  0x15   :  { %s31_s22 = sshll.u32 %s1769_s21, 4  ;;  %s56_s29 = sshll.u32 %s1263_s28, 4  ;;  %s32_s22 = int_to_ptr.hbm [resolvable:$true] %s31_s22  ;;  %s57_s29 = int_to_ptr.vmem [resolvable:$true] %s56_s29 }
  0x16   :  { %36 = dma.hbm_to_vmem [thread:$0]  %s32_s22, 512, %s34_s25, [#allocation3]  }
  0x17   :  { %s1265_s15 = smov 32  }
  0x19   :  { %s54_s27 = sshll.u32 %s1770_s16, 4  ;;  %s55_s27 = int_to_ptr.hbm [resolvable:$true] %s54_s27 }
  0x1a   :  { %62 = dma.hbm_to_vmem [thread:$0]  %s55_s27, 1024, %s57_s29, [#allocation6], %s1264_s0, %s1264_s0, %s1265_s15  }
  0x1b   :  { %1253 = dma.done.wait [#allocation3], 512  }
  0x1c   :  { %1254 = vsyncadd [#allocation3], 4294966784 }
  0x1d   :  { %1255 = dma.done.wait [#allocation6], 5120  }
  0x1e   :  { %1256 = vsyncadd [#allocation6], 4294962176  ;;  %v1386_v0 = vld [vmem:[#allocation2 + $0x18] sm:$0xff]  ;;  %v1388_v1 = vld [vmem:[#allocation2 + $0x10] sm:$0xff]  ;;  %s1266_s16 = smov 113   ;;  %s1267_s18 = smov 111   ;;  %v126_v6 = vlaneseq }
  0x1f   :  { %v1390_v2 = vld [vmem:[#allocation2] sm:$0xff]  ;;  %231 = vrot.lane.b32.xlu2 %v1386_v0, %s1266_s16  ;;  %271 = vrot.lane.b32.xlu0 %v1388_v1, %s1267_s18  ;;  %s1268_s30 = smov 112   ;;  %v1401_v3 = vld [vmem:[#allocation2 + $0x8] sm:$0xff]  ;;  %s1269_s15 = smov 127   ;;  %vm319_vm1 = vcmask 1043456   ;;  %v1453_v28 = vld [vmem:[#allocation7 + $0x10] sm:$0xff] }
  0x20   :  { %267 = vrot.lane.b32.xlu1 %v1390_v2, %s1267_s18  ;;  %s1270_s19 = smov 15   ;;  %s1271_s1 = smov 1   ;;  %v1438_v8 = vand.u32 127, %v126_v6  ;;  %v1153_v9 = vld [vmem:[#allocation7 + $0x28] ss:$0 sm:$0xff]  ;;  %v1455_v31 = vld [vmem:[#allocation7 + $0x18] sm:$0xff] }
  0x21   :  { %s1272_s20 = smov 17   ;;  %s1273_s21 = smov 16   ;;  %v1152_v10 = vld [vmem:[#allocation7 + $0x20] ss:$0 sm:$0xff]  ;;  %v1154_v21 = vld [vmem:[#allocation7 + $0x30] ss:$0 sm:$0xff] }
  0x22   :  { %vm275_vm0 = vcmp.lt.s32.totalorder %v1438_v8, 111  ;;  %v1155_v22 = vld [vmem:[#allocation7 + $0x38] ss:$0 sm:$0xff]  ;;  %vm233_vm2 = vcmp.lt.s32.totalorder %v1438_v8, 113  ;;  %v240_v34 = vperm.slane %v1453_v28, 6  ;;  %vm254_vm3 = vcmp.lt.s32.totalorder %v1438_v8, 112 }
  0x23   :  { %v261_v37 = vperm.slane %v1453_v28, 7  ;;  %v262_v38 = vperm.slane %v1455_v31, 7  ;;  %v241_v40 = vperm.slane %v1455_v31, 6  ;;  %vm212_vm4 = vcmp.lt.s32.totalorder %v1438_v8, 127  ;;  %s1277_s26 = smov 119   ;;  %s1278_s27 = smov 8  }
  0x24   :  { %v219_v53 = vperm.slane %v1453_v28, 5  ;;  %v220_v59 = vperm.slane %v1455_v31, 5  ;;  %vm170_vm5 = vcmp.lt.s32.totalorder %v1438_v8, 15  ;;  %vm191_vm6 = vcmp.lt.s32.totalorder %v1438_v8, 1  ;;  %s1279_s28 = smov 120   ;;  %s1771_s29 = sld [smem:[#allocation15_spill]] }
  0x25   :  { %vm128_vm7 = vcmp.lt.s32.totalorder %v1438_v8, 17  ;;  %vm149_vm8 = vcmp.lt.s32.totalorder %v1438_v8, 16  ;;  %vm315_vm9 = vcmask 588800   ;;  %v1099_v8 = vld [vmem:[#allocation5 + $0x28] sm:$0xff] }
  0x27   :  { %250 = vrot.lane.b32.xlu2 %v1388_v1, %s1268_s30  ;;  %273 = vrot.lane.b32.xlu0 %v1386_v0, %s1267_s18 }
  0x28   :  { %229 = vrot.lane.b32.xlu1 %v1388_v1, %s1266_s16 }
  0x2f   :  { %252 = vrot.lane.b32.xlu0 %v1386_v0, %s1268_s30  ;;  %246 = vrot.lane.b32.xlu2 %v1390_v2, %s1268_s30 }
  0x30   :  { %225 = vrot.lane.b32.xlu1 %v1390_v2, %s1266_s16 }
  0x37   :  { %208 = vrot.lane.b32.xlu0 %v1388_v1, %s1269_s15  ;;  %269 = vrot.lane.b32.xlu2 %v1401_v3, %s1267_s18 }
  0x38   :  { %210 = vrot.lane.b32.xlu1 %v1386_v0, %s1269_s15 }
  0x3f   :  { %204 = vrot.lane.b32.xlu0 %v1390_v2, %s1269_s15  ;;  %166 = vrot.lane.b32.xlu2 %v1388_v1, %s1270_s19 }
  0x40   :  { %164 = vrot.lane.b32.xlu1 %v1401_v3, %s1270_s19 }
  0x47   :  { %185 = vrot.lane.b32.xlu0 %v1401_v3, %s1271_s1  ;;  %168 = vrot.lane.b32.xlu2 %v1386_v0, %s1270_s19 }
  0x48   :  { %187 = vrot.lane.b32.xlu1 %v1388_v1, %s1271_s1 }
  0x4f   :  { %189 = vrot.lane.b32.xlu0 %v1386_v0, %s1271_s1  ;;  %248 = vrot.lane.b32.xlu2 %v1401_v3, %s1268_s30 }
  0x50   :  { %227 = vrot.lane.b32.xlu1 %v1401_v3, %s1266_s16  ;;  %s1280_s16 = smov 9  }
  0x57   :  { %120 = vrot.lane.b32.xlu0 %v1401_v3, %s1272_s20  ;;  %143 = vrot.lane.b32.xlu2 %v1401_v3, %s1273_s21 }
  0x58   :  { %122 = vrot.lane.b32.xlu1 %v1388_v1, %s1272_s20 }
  0x5f   :  { %145 = vrot.lane.b32.xlu0 %v1388_v1, %s1273_s21  ;;  %147 = vrot.lane.b32.xlu2 %v1386_v0, %s1273_s21 }
  0x60   :  { %124 = vrot.lane.b32.xlu1 %v1386_v0, %s1272_s20 }
  0x67   :  { %206 = vrot.lane.b32.xlu0 %v1401_v3, %s1269_s15  ;;  %183 = vrot.lane.b32.xlu2 %v1390_v2, %s1271_s1 }
  0x68   :  { %162 = vrot.lane.b32.xlu1 %v1390_v2, %s1270_s19 }
  0x6f   :  { %118 = vrot.lane.b32.xlu0 %v1390_v2, %s1272_s20 }
  0x70   :  { %141 = vrot.lane.b32.xlu1 %v1390_v2, %s1273_s21 }
  0x79   :  { %v232_v4 = vpop.permute.xlu2 %231 }
  0x81   :  { %v1434_v5 = vpop.permute.xlu2 %250 }
  0x89   :  { %v1436_v7 = vpop.permute.xlu2 %246 }
  0x91   :  { %v272_v11 = vpop.permute.xlu0 %271  ;;  %v270_v12 = vpop.permute.xlu2 %269 }
  0x92   :  { %v277_v13 = vsel %vm275_vm0, %v270_v12, %v272_v11  ;;  %v268_v14 = vpop.permute.xlu1 %267 }
  0x93   :  { %v278_v15 = vsel %vm275_vm0, %v268_v14, %v270_v12  ;;  %v285_v16 = vmul.f32 %v1153_v9, %v277_v13  ;;  %v198_v9 = vperm.slane %v1453_v28, 3 }
  0x94   :  { %v284_v17 = vmul.f32 %v1152_v10, %v278_v15 }
  0x95   :  { %v305_v18 = vpack.c.bf16 %v285_v16, %v285_v16  ;;  %v1507_v16 = vld [vmem:[#allocation7 + $0x8] sm:$0xff] }
  0x96   :  { %v304_v19 = vpack.c.bf16 %v284_v17, %v284_v17  ;;  %v1509_v17 = vld [vmem:[#allocation7] sm:$0xff] }
  0x97   :  { %v324_v20 = vsel %vm319_vm1, %v305_v18, 0 }
  0x98   :  { %v321_v23 = vsel %vm319_vm1, %v304_v19, 0  ;;  %349 = vmatpush.bf16.msra.mxu1 %v324_v20  ;;  %v178_v19 = vperm.slane %v1455_v31, 2  ;;  %v199_v20 = vperm.slane %v1455_v31, 3 }
  0x99   :  { %335 = vmatpush.bf16.msra.mxu0 %v321_v23  ;;  %v274_v24 = vpop.permute.xlu0 %273  ;;  %v167_v52 = vpop.permute.xlu2 %166  ;;  %v239_v23 = vperm.slane %v1507_v16, 6 }
  0x9a   :  { %v276_v25 = vsel %vm275_vm0, %v272_v11, %v274_v24  ;;  %v279_v26 = vsel %vm275_vm0, %v274_v24, %v268_v14  ;;  %v1451_v27 = vpop.permute.xlu1 %229  ;;  %v259_v24 = vperm.slane %v1509_v17, 7 }
  0x9b   :  { %v286_v29 = vmul.f32 %v1154_v21, %v276_v25  ;;  %v287_v30 = vmul.f32 %v1155_v22, %v279_v26  ;;  %v234_v39 = vsel %vm233_vm2, %v1451_v27, %v232_v4  ;;  %v260_v22 = vperm.slane %v1507_v16, 7 }
  0x9c   :  { %v244_v45 = vmul.f32 %v240_v34, %v234_v39 }
  0x9d   :  { %v306_v32 = vpack.c.bf16 %v286_v29, %v286_v29  ;;  %v307_v33 = vpack.c.bf16 %v287_v30, %v287_v30  ;;  %v238_v29 = vperm.slane %v1509_v17, 6 }
  0x9f   :  { %v327_v35 = vsel %vm319_vm1, %v306_v32, 0  ;;  %v330_v36 = vsel %vm319_vm1, %v307_v33, 0 }
  0xa0   :  { %363 = vmatpush.bf16.msra.mxu2 %v327_v35  ;;  %377 = vmatpush.bf16.msra.mxu3 %v330_v36 }
  0xa1   :  { %v253_v41 = vpop.permute.xlu0 %252  ;;  %v1485_v60 = vpop.permute.xlu2 %168 }
  0xa2   :  { %v255_v42 = vsel %vm254_vm3, %v1434_v5, %v253_v41  ;;  %v258_v43 = vsel %vm254_vm3, %v253_v41, %v1436_v7  ;;  %v226_v44 = vpop.permute.xlu1 %225  ;;  %v171_v21 = vsel %vm170_vm5, %v167_v52, %v1485_v60 }
  0xa3   :  { %v265_v46 = vmul.f32 %v261_v37, %v255_v42  ;;  %v266_v47 = vmul.f32 %v262_v38, %v258_v43  ;;  %v237_v48 = vsel %vm233_vm2, %v232_v4, %v226_v44  ;;  %v182_v34 = vmul.f32 %v178_v19, %v171_v21 }
  0xa4   :  { %v245_v49 = vmul.f32 %v241_v40, %v237_v48  ;;  %v157_v48 = vperm.slane %v1455_v31, 1  ;;  %v176_v21 = vperm.slane %v1507_v16, 2 }
  0xa5   :  { %v302_v50 = vpack.c.bf16 %v265_v46, %v244_v45 }
  0xa6   :  { %v303_v51 = vpack.c.bf16 %v266_v47, %v245_v49  ;;  %v156_v47 = vperm.slane %v1453_v28, 1 }
  0xa7   :  { %364 = vmatpush.bf16.msra.mxu2 %v302_v50  ;;  %v136_v50 = vperm.slane %v1455_v31, 0  ;;  %v1125_v31 = vld [vmem:[#allocation5 + $0xf8] sm:$0xff] }
  0xa8   :  { %378 = vmatpush.bf16.msra.mxu3 %v303_v51 }
  0xa9   :  { %v1478_v54 = vpop.permute.xlu0 %208  ;;  %v249_v13 = vpop.permute.xlu2 %248 }
  0xaa   :  { %v211_v55 = vpop.permute.xlu1 %210  ;;  %v256_v25 = vsel %vm254_vm3, %v249_v13, %v1434_v5  ;;  %v257_v30 = vsel %vm254_vm3, %v1436_v7, %v249_v13 }
  0xab   :  { %v213_v56 = vsel %vm212_vm4, %v1478_v54, %v211_v55  ;;  %v264_v5 = vmul.f32 %v260_v22, %v256_v25  ;;  %v263_v39 = vmul.f32 %v259_v24, %v257_v30  ;;  %v1115_v30 = vld [vmem:[#allocation5 + $0xa8] sm:$0xff] }
  0xac   :  { %v223_v57 = vmul.f32 %v219_v53, %v213_v56 }
  0xae   :  { %v298_v58 = vpack.c.bf16 %v223_v57, %v1388_v1  ;;  %v177_v1 = vperm.slane %v1453_v28, 2 }
  0xb0   :  { %365 = vmatpush.bf16.msra.mxu2 %v298_v58 }
  0xb1   :  { %v1487_v61 = vpop.permute.xlu0 %204  ;;  %v1536_v40 = vpop.permute.xlu2 %143 }
  0xb2   :  { %v216_v62 = vsel %vm212_vm4, %v211_v55, %v1487_v61  ;;  %v1492_v63 = vpop.permute.xlu1 %164 }
  0xb3   :  { %v224_v4 = vmul.f32 %v220_v59, %v216_v62  ;;  %v172_v10 = vsel %vm170_vm5, %v1492_v63, %v167_v52  ;;  %v1117_v62 = vld [vmem:[#allocation5 + $0xb8] sm:$0xff] }
  0xb4   :  { %v181_v14 = vmul.f32 %v177_v1, %v172_v10  ;;  %v1562_v1 = vld [vmem:[%s1754_s11] sm:$0xff]  ;;  %v218_v10 = vperm.slane %v1507_v16, 5 }
  0xb5   :  { %v299_v6 = vpack.c.bf16 %v224_v4, %v1386_v0 }
  0xb7   :  { %379 = vmatpush.bf16.msra.mxu3 %v299_v6 }
  0xb9   :  { %v1502_v11 = vpop.permute.xlu0 %185 }
  0xba   :  { %v188_v12 = vpop.permute.xlu1 %187 }
  0xbb   :  { %v193_v0 = vsel %vm191_vm6, %v1502_v11, %v188_v12 }
  0xbc   :  { %v202_v15 = vmul.f32 %v198_v9, %v193_v0  ;;  %v217_v9 = vperm.slane %v1509_v17, 5 }
  0xbe   :  { %v294_v18 = vpack.c.bf16 %v202_v15, %v181_v14  ;;  %v175_v14 = vperm.slane %v1509_v17, 2  ;;  %v1124_v15 = vld [vmem:[#allocation5 + $0xf0] sm:$0xff] }
  0xc0   :  { %366 = vmatpush.bf16.msra.mxu2 %v294_v18  ;;  %v196_v18 = vperm.slane %v1509_v17, 3 }
  0xc1   :  { %v1522_v26 = vpop.permute.xlu0 %189 }
  0xc2   :  { %v192_v32 = vsel %vm191_vm6, %v188_v12, %v1522_v26  ;;  %v228_v33 = vpop.permute.xlu1 %227  ;;  %v1116_v12 = vld [vmem:[#allocation5 + $0xb0] sm:$0xff] }
  0xc3   :  { %v203_v35 = vmul.f32 %v199_v20, %v192_v32  ;;  %v235_v36 = vsel %vm233_vm2, %v228_v33, %v1451_v27  ;;  %v236_v37 = vsel %vm233_vm2, %v226_v44, %v228_v33  ;;  %v1541_v27 = vpop.permute.xlu2 %147  ;;  %v135_v44 = vperm.slane %v1453_v28, 0 }
  0xc4   :  { %v243_v38 = vmul.f32 %v239_v23, %v235_v36  ;;  %v242_v7 = vmul.f32 %v238_v29, %v236_v37 }
  0xc5   :  { %v295_v41 = vpack.c.bf16 %v203_v35, %v182_v34  ;;  %v1123_v34 = vld [vmem:[#allocation5 + $0xe8] sm:$0xff] }
  0xc6   :  { %v301_v42 = vpack.c.bf16 %v264_v5, %v243_v38  ;;  %v300_v43 = vpack.c.bf16 %v263_v39, %v242_v7  ;;  %v133_v5 = vperm.slane %v1509_v17, 0  ;;  %v154_v38 = vperm.slane %v1509_v17, 1  ;;  %v1114_v39 = vld [vmem:[#allocation5 + $0xa0] sm:$0xff] }
  0xc7   :  { %380 = vmatpush.bf16.msra.mxu3 %v295_v41 }
  0xc8   :  { %350 = vmatpush.bf16.msra.mxu1 %v301_v42  ;;  %336 = vmatpush.bf16.msra.mxu0 %v300_v43 }
  0xc9   :  { %v1538_v45 = vpop.permute.xlu0 %120 }
  0xca   :  { %v123_v46 = vpop.permute.xlu1 %122 }
  0xcb   :  { %v130_v49 = vsel %vm128_vm7, %v1538_v45, %v123_v46  ;;  %v184_v13 = vpop.permute.xlu2 %183 }
  0xcc   :  { %v139_v56 = vmul.f32 %v135_v44, %v130_v49  ;;  %v195_v29 = vsel %vm191_vm6, %v1522_v26, %v184_v13  ;;  %v194_v32 = vsel %vm191_vm6, %v184_v13, %v1502_v11  ;;  %v134_v26 = vperm.slane %v1507_v16, 0  ;;  %v1095_v13 = vld [vmem:[#allocation5 + $0x8] sm:$0xff] }
  0xcd   :  { %v200_v36 = vmul.f32 %v196_v18, %v195_v29  ;;  %v155_v11 = vperm.slane %v1507_v16, 1  ;;  %v725_v18 = vld [vmem:[%s1748_s5] sm:$0xff]  ;;  %s1276_s5 = smov 121  }
  0xd1   :  { %v146_v51 = vpop.permute.xlu0 %145 }
  0xd2   :  { %v150_v52 = vsel %vm149_vm8, %v146_v51, %v1541_v27  ;;  %v151_v53 = vsel %vm149_vm8, %v1536_v40, %v146_v51  ;;  %v125_v55 = vpop.permute.xlu1 %124 }
  0xd3   :  { %v160_v28 = vmul.f32 %v156_v47, %v151_v53  ;;  %v161_v57 = vmul.f32 %v157_v48, %v150_v52  ;;  %v129_v58 = vsel %vm128_vm7, %v123_v46, %v125_v55  ;;  %v1113_v53 = vld [vmem:[#allocation5 + $0x98] sm:$0xff] }
  0xd4   :  { %v140_v59 = vmul.f32 %v136_v50, %v129_v58  ;;  %v1109_v50 = vld [vmem:[#allocation5 + $0x78] sm:$0xff]  ;;  %v1098_v58 = vld [vmem:[#allocation5 + $0x20] sm:$0xff] }
  0xd5   :  { %v290_v4 = vpack.c.bf16 %v160_v28, %v139_v56  ;;  %v1108_v56 = vld [vmem:[#allocation5 + $0x70] sm:$0xff] }
  0xd6   :  { %v291_v6 = vpack.c.bf16 %v161_v57, %v140_v59  ;;  %v1112_v28 = vld [vmem:[#allocation5 + $0x90] sm:$0xff]  ;;  %v1106_v59 = vld [vmem:[#allocation5 + $0x60] sm:$0xff] }
  0xd7   :  { %367 = vmatpush.bf16.msra.mxu2 %v290_v4  ;;  %v1120_v57 = vld [vmem:[#allocation5 + $0xd0] sm:$0xff]  ;;  %v1119_v4 = vld [vmem:[#allocation5 + $0xc8] sm:$0xff] }
  0xd8   :  { %381 = vmatpush.bf16.msra.mxu3 %v291_v6  ;;  %v1105_v6 = vld [vmem:[#allocation5 + $0x58] sm:$0xff] }
  0xd9   :  { %v207_v0 = vpop.permute.xlu0 %206 }
  0xda   :  { %v214_v19 = vsel %vm212_vm4, %v207_v0, %v1478_v54  ;;  %v215_v20 = vsel %vm212_vm4, %v1487_v61, %v207_v0  ;;  %v163_v22 = vpop.permute.xlu1 %162  ;;  %960 = vmatmul.msk.bf16.vlgmr.msra.gmra.mxu2 %vm315_vm9, %v1562_v1  ;;  %v197_v61 = vperm.slane %v1507_v16, 3  ;;  %v1103_v0 = vld [vmem:[#allocation5 + $0x48] sm:$0xff] }
  0xdb   :  { %676 = vmatpush.bf16.msrb.mxu2 %v1117_v62  ;;  %v221_v23 = vmul.f32 %v217_v9, %v215_v20  ;;  %v222_v24 = vmul.f32 %v218_v10, %v214_v19  ;;  %v173_v25 = vsel %vm170_vm5, %v163_v22, %v1492_v63  ;;  %v174_v54 = vsel %vm170_vm5, %v1485_v60, %v163_v22  ;;  %v1111_v62 = vld [vmem:[#allocation5 + $0x88] sm:$0xff]  ;;  %v1118_v9 = vld [vmem:[#allocation5 + $0xc0] sm:$0xff]  ;;  %v1096_v10 = vld [vmem:[#allocation5 + $0x10] sm:$0xff] }
  0xdc   :  { %690 = vmatpush.bf16.msrb.mxu3 %v1125_v31  ;;  %v179_v63 = vmul.f32 %v175_v14, %v174_v54  ;;  %v180_v35 = vmul.f32 %v176_v21, %v173_v25  ;;  %v201_v37 = vmul.f32 %v197_v61, %v194_v32  ;;  %v1097_v31 = vld [vmem:[#allocation5 + $0x18] sm:$0xff]  ;;  %v1094_v14 = vld [vmem:[#allocation5] sm:$0xff]  ;;  %v1274_v20 = vmov 0  }
  0xdd   :  { %961 = vmatmul.msk.bf16.vlgmr.msra.gmra.mxu3 %vm315_vm9, %v1562_v1  ;;  %v296_v33 = vpack.c.bf16 %v221_v23, %v1390_v2  ;;  %v297_v60 = vpack.c.bf16 %v222_v24, %v1401_v3  ;;  %v1122_v3 = vld [vmem:[#allocation5 + $0xe0] sm:$0xff]  ;;  %1150 = vset.pattern.permute.xlu0 %v1274_v20 }
  0xde   :  { %v292_v7 = vpack.c.bf16 %v200_v36, %v179_v63  ;;  %v293_v46 = vpack.c.bf16 %v201_v37, %v180_v35  ;;  %v718_v19 = vld [vmem:[%s1747_s4] sm:$0xff]  ;;  %1149 = vset.pattern.permute.xlu2 %v1274_v20  ;;  %728 = vperm.xlu0 %1150, %v725_v18   ;;  %s1275_s4 = smov 7  }
  0xdf   :  { %677 = vmatpush.bf16.msrb.mxu2 %v1116_v12  ;;  %337 = vmatpush.bf16.msra.mxu0 %v296_v33  ;;  %v1104_v12 = vld [vmem:[#allocation5 + $0x50] sm:$0xff] }
  0xe0   :  { %691 = vmatpush.bf16.msrb.mxu3 %v1124_v15  ;;  %351 = vmatpush.bf16.msra.mxu1 %v297_v60  ;;  %v1102_v15 = vld [vmem:[#allocation5 + $0x40] sm:$0xff] }
  0xe1   :  { %v119_v2 = vpop.permute.xlu0 %118  ;;  %721 = vperm.xlu2 %1149, %v718_v19   ;;  %1151 = vset.pattern.permute.xlu1 %v1274_v20 }
  0xe2   :  { %v131_v41 = vsel %vm128_vm7, %v119_v2, %v1538_v45  ;;  %v132_v42 = vsel %vm128_vm7, %v125_v55, %v119_v2  ;;  %v142_v43 = vpop.permute.xlu1 %141  ;;  %v1101_v45 = vld [vmem:[#allocation5 + $0x38] sm:$0xff] }
  0xe3   :  { %678 = vmatpush.bf16.msrb.mxu2 %v1115_v30  ;;  %v137_v44 = vmul.f32 %v133_v5, %v132_v42  ;;  %v138_v47 = vmul.f32 %v134_v26, %v131_v41  ;;  %v152_v16 = vsel %vm149_vm8, %v142_v43, %v1536_v40  ;;  %v153_v17 = vsel %vm149_vm8, %v1541_v27, %v142_v43  ;;  %v1121_v55 = vld [vmem:[#allocation5 + $0xd8] sm:$0xff]  ;;  %v1100_v40 = vld [vmem:[#allocation5 + $0x30] sm:$0xff]  ;;  %v1107_v27 = vld [vmem:[#allocation5 + $0x68] sm:$0xff] }
  0xe4   :  { %692 = vmatpush.bf16.msrb.mxu3 %v1123_v34  ;;  %338 = vmatpush.bf16.msra.mxu0 %v292_v7  ;;  %v158_v48 = vmul.f32 %v154_v38, %v153_v17  ;;  %v159_v49 = vmul.f32 %v155_v11, %v152_v16  ;;  %v792_v41 = vld [vmem:[%s1749_s6] sm:$0xff] }
  0xe5   :  { %352 = vmatpush.bf16.msra.mxu1 %v293_v46  ;;  %v704_v42 = vld [vmem:[%s1752_s9] sm:$0xff]  ;;  %v1642_v46 = vld [vmem:[%s1746_s3 + $0x8] ss:$0 sm:$0xff] }
  0xe6   :  { %v288_v51 = vpack.c.bf16 %v158_v48, %v137_v44  ;;  %v289_v52 = vpack.c.bf16 %v159_v49, %v138_v47  ;;  %v799_v43 = vld [vmem:[%s1750_s7] sm:$0xff] }
  0xe7   :  { %679 = vmatpush.bf16.msrb.mxu2 %v1114_v39  ;;  %v733_v17 = vld [vmem:[%s1746_s3] sm:$0xff] }
  0xe8   :  { %693 = vmatpush.bf16.msrb.mxu3 %v1122_v3  ;;  %339 = vmatpush.bf16.msra.mxu0 %v288_v51  ;;  %v711_v3 = vld [vmem:[%s1753_s10] sm:$0xff]  ;;  %v1648_v49 = vperm.slane %v733_v17, 6 }
  0xe9   :  { %353 = vmatpush.bf16.msra.mxu1 %v289_v52  ;;  %v1653_v52 = vperm.slane %v733_v17, 5 }
  0xeb   :  { %680 = vmatpush.bf16.msrb.mxu2 %v1113_v53  ;;  %958 = vmatmul.msk.bf16.vlgmr.msra.gmra.mxu0 %vm315_vm9, %v1562_v1 }
  0xec   :  { %648 = vmatpush.bf16.msrb.mxu0 %v1101_v45  ;;  %694 = vmatpush.bf16.msrb.mxu3 %v1121_v55 }
  0xed   :  { %662 = vmatpush.bf16.msrb.mxu1 %v1109_v50  ;;  %v1651_v50 = vperm.slane %v733_v17, 7 }
  0xee   :  { %959 = vmatmul.msk.bf16.vlgmr.msra.gmra.mxu1 %vm315_vm9, %v1562_v1  ;;  %v1110_v1 = vld [vmem:[#allocation5 + $0x80] sm:$0xff] }
  0xef   :  { %681 = vmatpush.bf16.msrb.mxu2 %v1112_v28  ;;  %v1658_v28 = vperm.slane %v733_v17, 2 }
  0xf0   :  { %649 = vmatpush.bf16.msrb.mxu0 %v1100_v40  ;;  %695 = vmatpush.bf16.msrb.mxu3 %v1120_v57  ;;  %v1660_v57 = vperm.slane %v733_v17, 3 }
  0xf1   :  { %663 = vmatpush.bf16.msrb.mxu1 %v1108_v56 }
  0xf3   :  { %682 = vmatpush.bf16.msrb.mxu2 %v1111_v62 }
  0xf4   :  { %650 = vmatpush.bf16.msrb.mxu0 %v1099_v8  ;;  %696 = vmatpush.bf16.msrb.mxu3 %v1119_v4 }
  0xf5   :  { %664 = vmatpush.bf16.msrb.mxu1 %v1107_v27 }
  0xf7   :  { %683 = vmatpush.bf16.msrb.mxu2 %v1110_v1 }
  0xf8   :  { %651 = vmatpush.bf16.msrb.mxu0 %v1098_v58  ;;  %697 = vmatpush.bf16.msrb.mxu3 %v1118_v9 }
  0xf9   :  { %665 = vmatpush.bf16.msrb.mxu1 %v1106_v59  ;;  %v1662_v59 = vperm.slane %v733_v17, 1 }
  0xfc   :  { %652 = vmatpush.bf16.msrb.mxu0 %v1097_v31  ;;  %v1664_v31 = vperm.slane %v733_v17, 0 }
  0xfd   :  { %666 = vmatpush.bf16.msrb.mxu1 %v1105_v6 }
 0x100   :  { %653 = vmatpush.bf16.msrb.mxu0 %v1096_v10 }
 0x101   :  { %667 = vmatpush.bf16.msrb.mxu1 %v1104_v12 }
 0x104   :  { %654 = vmatpush.bf16.msrb.mxu0 %v1095_v13 }
 0x105   :  { %668 = vmatpush.bf16.msrb.mxu1 %v1103_v0 }
 0x108   :  { %655 = vmatpush.bf16.msrb.mxu0 %v1094_v14  ;;  %v772_v14 = vld [vmem:[%s1751_s8] sm:$0xf] }
 0x109   :  { %669 = vmatpush.bf16.msrb.mxu1 %v1102_v15 }
 0x13b   :  { %v722_v37 = vpop.permute.xlu2 %721 }
 0x150   :  { %v729_v11 = vpop.permute.xlu0 %728 }
 0x15d   :  { %v369_v21 = vpop.f32.mrf.mxu2 }
 0x160   :  { %v383_v22 = vpop.f32.mrf.mxu3 }
 0x165   :  { %v371_v23 = vpop.f32.mrf.mxu2 }
 0x166   :  { %v390_v24 = vpack.c.bf16 %v371_v23, %v369_v21 }
 0x168   :  { %v385_v25 = vpop.f32.mrf.mxu3  ;;  %v341_v61 = vpop.f32.mrf.mxu0  ;;  %684 = vmatmul.bf16.vlgmr.msrb.gmra.mxu2 %v390_v24 }
 0x169   :  { %v391_v54 = vpack.c.bf16 %v385_v25, %v383_v22 }
 0x16b   :  { %v355_v29 = vpop.f32.mrf.mxu1  ;;  %698 = vmatmul.bf16.vlgmr.msrb.gmra.mxu3 %v391_v54 }
 0x170   :  { %v343_v30 = vpop.f32.mrf.mxu0 }
 0x171   :  { %v388_v63 = vpack.c.bf16 %v343_v30, %v341_v61 }
 0x173   :  { %v357_v32 = vpop.f32.mrf.mxu1  ;;  %656 = vmatmul.bf16.vlgmr.msrb.gmra.mxu0 %v388_v63 }
 0x174   :  { %v389_v33 = vpack.c.bf16 %v357_v32, %v355_v29 }
 0x176   :  { %670 = vmatmul.bf16.vlgmr.msrb.gmra.mxu1 %v389_v33 }
 0x1eb   :  { %v685_v36 = vpop.f32.mrf.mxu2 }
 0x1ee   :  { %v699_v26 = vpop.f32.mrf.mxu3 }
 0x1f0   :  { %v657_v60 = vpop.f32.mrf.mxu0 }
 0x1f3   :  { %v671_v34 = vpop.f32.mrf.mxu1  ;;  %v687_v20 = vpop.f32.mrf.mxu2 }
 0x1f4   :  { %v672_v35 = vadd.f32 %v671_v34, %v657_v60 }
 0x1f6   :  { %v686_v5 = vadd.f32 %v685_v36, %v672_v35  ;;  %v701_v23 = vpop.f32.mrf.mxu3  ;;  %v856_v35 = vld [vmem:[%s1755_s12] sm:$0xff] }
 0x1f7   :  { %v863_v36 = vld [vmem:[%s1756_s13] sm:$0xff] }
 0x1f8   :  { %v700_v38 = vadd.f32 %v699_v26, %v686_v5  ;;  %v659_v15 = vpop.f32.mrf.mxu0 }
 0x1fa   :  { %v724_v39 = vmul.f32 %v722_v37, %v700_v38 }
 0x1fb   :  { %v673_v18 = vpop.f32.mrf.mxu1 }
 0x1fc   :  { %v731_v2 = vadd.f32 %v729_v11, %v724_v39  ;;  %v674_v19 = vadd.f32 %v673_v18, %v659_v15 }
 0x1fe   :  { %v732_v7 = vmax.f32 %v731_v2, 0.0  ;;  %v688_v21 = vadd.f32 %v687_v20, %v674_v19 }
 0x200   :  { %743 = vrot.lane.b32.xlu0 %v732_v7, %s1275_s4  ;;  %755 = vrot.lane.b32.xlu2 %v732_v7, %s1276_s5  ;;  %v702_v24 = vadd.f32 %v701_v23, %v688_v21 }
 0x201   :  { %763 = vrot.lane.b32.xlu1 %v732_v7, %s1277_s26 }
 0x208   :  { %739 = vrot.lane.b32.xlu0 %v732_v7, %s1278_s27  ;;  %751 = vrot.lane.b32.xlu2 %v732_v7, %s1269_s15 }
 0x209   :  { %759 = vrot.lane.b32.xlu1 %v732_v7, %s1279_s28 }
 0x210   :  { %714 = vperm.xlu0 %1150, %v711_v3   ;;  %735 = vrot.lane.b32.xlu2 %v732_v7, %s1280_s16 }
 0x211   :  { %747 = vrot.lane.b32.xlu1 %v732_v7, %s1271_s1 }
 0x218   :  { %795 = vperm.xlu2 %1149, %v792_v41  }
 0x219   :  { %707 = vperm.xlu1 %1151, %v704_v42  }
 0x221   :  { %802 = vperm.xlu1 %1151, %v799_v43  }
 0x25a   :  { %v756_v44 = vpop.permute.xlu2 %755 }
 0x25b   :  { %v758_v40 = vmul.f32 %v1648_v49, %v756_v44 }
 0x262   :  { %v752_v53 = vpop.permute.xlu2 %751 }
 0x263   :  { %v754_v8 = vmul.f32 %v1653_v52, %v752_v53 }
 0x265   :  { %v769_v58 = vpack.c.bf16 %v754_v8, %v732_v7 }
 0x26a   :  { %v736_v9 = vpop.permute.xlu2 %735 }
 0x26b   :  { %v738_v13 = vmul.f32 %v1664_v31, %v736_v9  ;;  %v920_v9 = vld [vmem:[%s1757_s14] sm:$0xff] }
 0x272   :  { %v744_v51 = vpop.permute.xlu0 %743  ;;  %v796_v54 = vpop.permute.xlu2 %795 }
 0x273   :  { %v764_v47 = vpop.permute.xlu1 %763  ;;  %v746_v6 = vmul.f32 %v1658_v28, %v744_v51 }
 0x274   :  { %v766_v16 = vmul.f32 %v1642_v46, %v764_v47 }
 0x276   :  { %v771_v48 = vpack.c.bf16 %v766_v16, %v766_v16 }
 0x278   :  { %v777_v45 = vsel %vm319_vm1, %v771_v48, 0 }
 0x279   :  { %782 = vmatpush.bf16.msra.mxu0 %v777_v45 }
 0x27a   :  { %v740_v62 = vpop.permute.xlu0 %739 }
 0x27b   :  { %v760_v55 = vpop.permute.xlu1 %759  ;;  %v742_v10 = vmul.f32 %v1662_v59, %v740_v62 }
 0x27c   :  { %v762_v56 = vmul.f32 %v1651_v50, %v760_v55 }
 0x27d   :  { %v767_v0 = vpack.c.bf16 %v742_v10, %v738_v13  ;;  %v927_v10 = vld [vmem:[%s1771_s29] sm:$0xff] }
 0x27e   :  { %v770_v27 = vpack.c.bf16 %v762_v56, %v758_v40  ;;  %v836_v56 = vld [vmem:[%s1760_s17] sm:$0xf] }
 0x280   :  { %783 = vmatpush.bf16.msra.mxu0 %v770_v27 }
 0x282   :  { %v715_v30 = vpop.permute.xlu0 %714 }
 0x283   :  { %v748_v4 = vpop.permute.xlu1 %747 }
 0x284   :  { %v750_v1 = vmul.f32 %v1660_v57, %v748_v4  ;;  %784 = vmatpush.bf16.msra.mxu0 %v769_v58 }
 0x286   :  { %v768_v12 = vpack.c.bf16 %v750_v1, %v746_v6 }
 0x288   :  { %785 = vmatpush.bf16.msra.mxu0 %v768_v12 }
 0x28b   :  { %v708_v22 = vpop.permute.xlu1 %707 }
 0x28c   :  { %786 = vmatpush.bf16.msra.mxu0 %v767_v0  ;;  %v710_v25 = vmul.f32 %v708_v22, %v702_v24 }
 0x28e   :  { %v717_v63 = vadd.f32 %v715_v30, %v710_v25 }
 0x28f   :  { %1090 = vmatmul.msk.bf16.vlgmr.msra.gmra.mxu0 %vm315_vm9, %v772_v14 }
 0x293   :  { %v803_v32 = vpop.permute.xlu1 %802 }
 0x30c   :  { %v788_v61 = vpop.f32.mrf.mxu0 }
 0x30d   :  { %v798_v29 = vmul.f32 %v796_v54, %v788_v61 }
 0x30f   :  { %v805_v33 = vadd.f32 %v803_v32, %v798_v29 }
 0x311   :  { %v1674_v60 = vadd.f32 %v805_v33, %v717_v63 }
 0x313   :  { %825 = vrot.lane.b32.xlu1 %v1674_v60, %s1279_s28  ;;  %822 = vrot.lane.b32.xlu0 %v1674_v60, %s1276_s5 }
 0x314   :  { %828 = vrot.lane.b32.xlu2 %v1674_v60, %s1277_s26  ;;  %v790_v34 = vpop.f32.mrf.mxu0 }
 0x31b   :  { %816 = vrot.lane.b32.xlu1 %v1674_v60, %s1271_s1  ;;  %813 = vrot.lane.b32.xlu0 %v1674_v60, %s1275_s4 }
 0x31c   :  { %819 = vrot.lane.b32.xlu2 %v1674_v60, %s1269_s15 }
 0x323   :  { %859 = vperm.xlu1 %1151, %v856_v35   ;;  %810 = vrot.lane.b32.xlu0 %v1674_v60, %s1278_s27 }
 0x324   :  { %807 = vrot.lane.b32.xlu2 %v1674_v60, %s1280_s16 }
 0x32c   :  { %866 = vperm.xlu2 %1149, %v863_v36  }
 0x36e   :  { %v829_v5 = vpop.permute.xlu2 %828 }
 0x36f   :  { %v830_v26 = vmul.f32 %v1642_v46, %v829_v5 }
 0x371   :  { %v835_v37 = vpack.c.bf16 %v830_v26, %v830_v26 }
 0x373   :  { %v841_v38 = vsel %vm319_vm1, %v835_v37, 0 }
 0x374   :  { %846 = vmatpush.bf16.msra.mxu1 %v841_v38 }
 0x376   :  { %v820_v11 = vpop.permute.xlu2 %819 }
 0x377   :  { %v821_v41 = vmul.f32 %v820_v11, %v1653_v52 }
 0x379   :  { %v833_v43 = vpack.c.bf16 %v821_v41, %v1674_v60 }
 0x37e   :  { %v808_v45 = vpop.permute.xlu2 %807 }
 0x37f   :  { %v809_v53 = vmul.f32 %v808_v45, %v1664_v31 }
 0x385   :  { %v826_v39 = vpop.permute.xlu1 %825  ;;  %v823_v2 = vpop.permute.xlu0 %822 }
 0x386   :  { %v827_v7 = vmul.f32 %v826_v39, %v1651_v50  ;;  %v824_v3 = vmul.f32 %v823_v2, %v1648_v49  ;;  %v867_v62 = vpop.permute.xlu2 %866 }
 0x388   :  { %v834_v42 = vpack.c.bf16 %v827_v7, %v824_v3 }
 0x38a   :  { %847 = vmatpush.bf16.msra.mxu1 %v834_v42 }
 0x38d   :  { %v817_v44 = vpop.permute.xlu1 %816  ;;  %v814_v47 = vpop.permute.xlu0 %813 }
 0x38e   :  { %v818_v16 = vmul.f32 %v817_v44, %v1660_v57  ;;  %v815_v17 = vmul.f32 %v814_v47, %v1658_v28  ;;  %848 = vmatpush.bf16.msra.mxu1 %v833_v43 }
 0x390   :  { %v832_v48 = vpack.c.bf16 %v818_v16, %v815_v17 }
 0x392   :  { %849 = vmatpush.bf16.msra.mxu1 %v832_v48 }
 0x395   :  { %v811_v51 = vpop.permute.xlu0 %810  ;;  %v860_v8 = vpop.permute.xlu1 %859 }
 0x396   :  { %v812_v55 = vmul.f32 %v811_v51, %v1662_v59 }
 0x398   :  { %v831_v40 = vpack.c.bf16 %v812_v55, %v809_v53 }
 0x39a   :  { %850 = vmatpush.bf16.msra.mxu1 %v831_v40 }
 0x39d   :  { %1091 = vmatmul.msk.bf16.vlgmr.msra.gmra.mxu1 %vm315_vm9, %v836_v56 }
 0x41a   :  { %v852_v27 = vpop.f32.mrf.mxu1 }
 0x41b   :  { %v862_v58 = vmul.f32 %v860_v8, %v852_v27 }
 0x41d   :  { %v869_v4 = vadd.f32 %v867_v62, %v862_v58 }
 0x41f   :  { %v870_v6 = vmax.f32 %v869_v4, 0.0 }
 0x421   :  { %889 = vrot.lane.b32.xlu2 %v870_v6, %s1279_s28  ;;  %886 = vrot.lane.b32.xlu1 %v870_v6, %s1276_s5 }
 0x422   :  { %892 = vrot.lane.b32.xlu0 %v870_v6, %s1277_s26  ;;  %v854_v1 = vpop.f32.mrf.mxu1 }
 0x429   :  { %880 = vrot.lane.b32.xlu2 %v870_v6, %s1271_s1  ;;  %877 = vrot.lane.b32.xlu1 %v870_v6, %s1275_s4  ;;  %s1772_s1 = sld [smem:[#allocation16_spill]]  ;;  %s1281_s4 = smov [#allocation8]  }
 0x42a   :  { %883 = vrot.lane.b32.xlu0 %v870_v6, %s1269_s15  ;;  %s941_s26 = sshll.u32 %s1281_s4, 4  ;;  %s942_s26 = int_to_ptr.vmem [resolvable:$true] %s941_s26 }
 0x431   :  { %923 = vperm.xlu2 %1149, %v920_v9   ;;  %874 = vrot.lane.b32.xlu1 %v870_v6, %s1278_s27 }
 0x432   :  { %871 = vrot.lane.b32.xlu0 %v870_v6, %s1280_s16  ;;  %s1773_s16 = sld [smem:[#allocation17_spill]] }
 0x438   :  { %s943_s18 = sshll.u32 %s1773_s16, 4  ;;  %s944_s18 = int_to_ptr.hbm [resolvable:$true] %s943_s18 }
 0x43a   :  { %930 = vperm.xlu0 %1150, %v927_v10  }
 0x47b   :  { %v890_v0 = vpop.permute.xlu2 %889 }
 0x47c   :  { %v891_v20 = vmul.f32 %v890_v0, %v1651_v50 }
 0x483   :  { %v881_v25 = vpop.permute.xlu2 %880 }
 0x493   :  { %v887_v12 = vpop.permute.xlu1 %886 }
 0x494   :  { %v893_v13 = vpop.permute.xlu0 %892  ;;  %v888_v18 = vmul.f32 %v887_v12, %v1648_v49 }
 0x495   :  { %v894_v14 = vmul.f32 %v1642_v46, %v893_v13  ;;  %v882_v46 = vmul.f32 %v881_v25, %v1660_v57 }
 0x496   :  { %v898_v22 = vpack.c.bf16 %v891_v20, %v888_v18 }
 0x497   :  { %v899_v15 = vpack.c.bf16 %v894_v14, %v894_v14 }
 0x499   :  { %v905_v19 = vsel %vm319_vm1, %v899_v15, 0 }
 0x49a   :  { %910 = vmatpush.bf16.msra.mxu2 %v905_v19 }
 0x49b   :  { %v878_v21 = vpop.permute.xlu1 %877 }
 0x49c   :  { %v884_v23 = vpop.permute.xlu0 %883  ;;  %v879_v61 = vmul.f32 %v878_v21, %v1658_v28  ;;  %v924_v28 = vpop.permute.xlu2 %923 }
 0x49d   :  { %v885_v24 = vmul.f32 %v884_v23, %v1653_v52  ;;  %v900_v52 = vld [vmem:[%s1772_s1] sm:$0xf] }
 0x49e   :  { %911 = vmatpush.bf16.msra.mxu2 %v898_v22  ;;  %v896_v49 = vpack.c.bf16 %v882_v46, %v879_v61 }
 0x49f   :  { %v897_v54 = vpack.c.bf16 %v885_v24, %v870_v6 }
 0x4a2   :  { %912 = vmatpush.bf16.msra.mxu2 %v897_v54 }
 0x4a3   :  { %v875_v29 = vpop.permute.xlu1 %874 }
 0x4a4   :  { %v876_v30 = vmul.f32 %v875_v29, %v1662_v59  ;;  %v872_v32 = vpop.permute.xlu0 %871 }
 0x4a5   :  { %v873_v50 = vmul.f32 %v872_v32, %v1664_v31 }
 0x4a6   :  { %913 = vmatpush.bf16.msra.mxu2 %v896_v49 }
 0x4a7   :  { %v895_v63 = vpack.c.bf16 %v876_v30, %v873_v50 }
 0x4aa   :  { %914 = vmatpush.bf16.msra.mxu2 %v895_v63 }
 0x4ac   :  { %v931_v34 = vpop.permute.xlu0 %930 }
 0x4ad   :  { %1092 = vmatmul.msk.bf16.vlgmr.msra.gmra.mxu2 %vm315_vm9, %v900_v52 }
 0x530   :  { %v916_v33 = vpop.f32.mrf.mxu2 }
 0x531   :  { %v926_v57 = vmul.f32 %v924_v28, %v916_v33 }
 0x533   :  { %v933_v59 = vadd.f32 %v931_v34, %v926_v57 }
 0x535   :  { %v934_v31 = vadd.f32 %v933_v59, %v1674_v60 }
 0x537   :  { %935 = vst [vmem:[#allocation8] sm:$0xff] %v934_v31 }
 0x538   :  { %v918_v35 = vpop.f32.mrf.mxu2  ;;  %946 = dma.vmem_to_hbm [thread:$0]  %s942_s26, 128, %s944_s18, [#allocation4]  }
 0x539   :  { %1257 = dma.done.wait [#allocation4], 128  }
 0x53a   :  { %1258 = vsyncadd [#allocation4], 4294967168 }
 0x53b   :  { %951 = vsyncpa [#allocation3], 1 }
 0x53c   :  { %952 = vsyncpa [#allocation6], 1 }
 0x53d   :  { %953 = vsyncpa [#allocation4], 1 }

</bundles_post_ra>
